<compile_context>
chip_gen: v6e
topology: v6e:2x2x1
jax: 0.10.0
libtpu: 0.0.40
codegen_flags: <defaults>
</compile_context>

<pallas_src>
import numpy as np

import jax
import jax.numpy as jnp
from jax.experimental import pallas as pl
from jax.experimental.pallas import tpu as pltpu


LANE = 128                               # TPU lane width; all channel dims padded to this
LASTN_BLOCKS = 2
MAXPOOL_SIZES = ((4, 2), (2, 1), (1,))   # per backbone stage (last-n are used)
STAGE_CHANNELS = (8, 16, 32)


# ----------------------------- parameter init ------------------------------ #

def init_backbone_params(key, in_ch=3, stage_channels=STAGE_CHANNELS):
    params = []
    cin = in_ch
    for cout in stage_channels:
        key, kw_, kb_ = jax.random.split(key, 3)
        scale = 1.0 / jnp.sqrt(cin * 9.0)
        w = jax.random.normal(kw_, (cout, cin, 3, 3), jnp.float32) * scale
        # keep weights bf16-representable: the kernel feeds them to the MXU as bf16
        w = w.astype(jnp.bfloat16).astype(jnp.float32)
        b = jax.random.normal(kb_, (cout,), jnp.float32) * 0.01
        params.append((w, b))
        cin = cout
    return params


# --------------------------- wrapper-side layout --------------------------- #

def _full_spec(shape):
    return pl.BlockSpec(shape, lambda *_: (0,) * len(shape))


def _im2col_input_patches(x_nchw):
    """One-time im2col of the network input (3x3 / stride 2 / pad 1).

    Returns bf16 patches of shape (B*Ho*Wo, Kpad); rows ordered (b, ho, wo),
    columns ordered (kh, kw, cin), K padded to a sublane multiple (27 -> 32).
    """
    B, Cin, H, W = x_nchw.shape
    Ho, Wo = H // 2, W // 2
    x = jnp.transpose(x_nchw, (0, 2, 3, 1))                       # NHWC, once at the boundary
    x = jnp.pad(x, ((0, 0), (1, 1), (1, 1), (0, 0)))
    taps = [x[:, kh:kh + 2 * Ho:2, kw:kw + 2 * Wo:2, :]
            for kh in range(3) for kw in range(3)]                # each (B, Ho, Wo, Cin)
    p = jnp.concatenate(taps, axis=-1).reshape(B * Ho * Wo, 9 * Cin)
    kpad = ((9 * Cin + 7) // 8) * 8
    p = jnp.pad(p, ((0, 0), (0, kpad - 9 * Cin)))
    return p.astype(jnp.bfloat16), Ho, Wo


def _weight_mat_stage1(w_oihw, k_pad):
    """(Cout,Cin,3,3) -> (k_pad, 128) bf16, rows ordered (kh, kw, cin)."""
    Cout, Cin, _, _ = w_oihw.shape
    wt = jnp.transpose(w_oihw, (2, 3, 1, 0)).reshape(9 * Cin, Cout)
    wt = jnp.pad(wt, ((0, k_pad - 9 * Cin), (0, LANE - Cout)))
    return wt.astype(jnp.bfloat16)


def _weight_mat_lane(w_oihw):
    """(Cout,Cin,3,3) -> (9*128, 128) bf16, rows ordered (kh, kw, cin_padded)."""
    Cout, Cin, _, _ = w_oihw.shape
    wt = jnp.transpose(w_oihw, (2, 3, 1, 0))                      # (3,3,Cin,Cout)
    wt = jnp.pad(wt, ((0, 0), (0, 0), (0, LANE - Cin), (0, LANE - Cout)))
    return wt.reshape(9 * LANE, LANE).astype(jnp.bfloat16)


def _bias_row(b):
    return jnp.pad(b, (0, LANE - b.shape[0])).reshape(1, LANE).astype(jnp.float32)


def _gather_matrix(B, Hin, Win):
    """Constant 0/1 operator implementing im2col (3x3/s2/p1) as a matmul.

    Shape (9*B*Ho*Wo, B*Hin*Win): row t*Mout + r selects the flattened input row
    feeding tap t of output position r; an all-zero row is the implicit zero pad.
    Depends only on shapes (compile-time constant in spirit).
    """
    Ho, Wo = Hin // 2, Win // 2
    Mout, Min = B * Ho * Wo, B * Hin * Win
    T = np.zeros((9 * Mout, Min), np.float32)
    for t, (kh, kw) in enumerate((a, c) for a in range(3) for c in range(3)):
        for b in range(B):
            for ho in range(Ho):
                for wo in range(Wo):
                    h_in, w_in = 2 * ho + kh - 1, 2 * wo + kw - 1
                    if 0 <= h_in < Hin and 0 <= w_in < Win:
                        T[t * Mout + (b * Ho + ho) * Wo + wo,
                          (b * Hin + h_in) * Win + w_in] = 1.0
    return jnp.asarray(T, jnp.bfloat16)


# ------------------------------ fused kernel ------------------------------- #

def _make_fused_kernel(B, spatial, sizes_lastn):
    """spatial: ((H1,W1),(H2,W2),(H3,W3)) conv-output spatial dims of the 3 stages."""
    (H1, W1), (H2, W2), (H3, W3) = spatial
    M1, M2, M3 = B * H1 * W1, B * H2 * W2, B * H3 * W3
    sizes2, sizes3 = sizes_lastn

    def _pool(y, hs, ws, s):
        # adaptive_max_pool2d(y, s): pure-VPU maximum tree over static row slices,
        # producing a dense (B*s*s, 128) block.
        kh, kw = hs // s, ws // s
        rows = []
        for b in range(B):
            for i in range(s):
                for j in range(s):
                    m = None
                    for dh in range(kh):
                        for dw in range(kw):
                            r = (b * hs + i * kh + dh) * ws + (j * kw + dw)
                            v = y[r:r + 1, :]
                            m = v if m is None else jnp.maximum(m, v)
                    rows.append(m)
        return jnp.concatenate(rows, axis=0)

    def kernel(p1_ref, w1_ref, b1_ref, t2_ref, w2_ref, b2_ref,
               t3_ref, w3_ref, b3_ref,
               y2_ref, y3_ref, *pool_refs):
        f32, bf16 = jnp.float32, jnp.bfloat16

        def conv(patches_bf16, w_ref, b_ref):
            acc = jnp.dot(patches_bf16, w_ref[...], preferred_element_type=f32)
            return jnp.maximum(acc + b_ref[...], 0.0)          # fused bias + ReLU

        def im2col(t_ref, y, m_out):
            # implicit im2col: constant 0/1 selection matmul gathers the 9 taps,
            # then a 128-aligned lane concat builds the (m_out, 9*128) patch block.
            g = jnp.dot(t_ref[...], y.astype(bf16), preferred_element_type=f32)
            taps = [g[t * m_out:(t + 1) * m_out, :] for t in range(9)]
            return jnp.concatenate(taps, axis=-1).astype(bf16)

        # stage 1 (intermediate only -- never leaves VMEM)
        y1 = conv(p1_ref[...], w1_ref, b1_ref)                  # (M1, 128)
        # stage 2
        y2 = conv(im2col(t2_ref, y1, M2), w2_ref, b2_ref)       # (M2, 128)
        y2_ref[...] = y2
        # stage 3
        y3 = conv(im2col(t3_ref, y2, M3), w3_ref, b3_ref)       # (M3, 128)
        y3_ref[...] = y3

        # fused adaptive max pools, lane-dense outputs
        k = 0
        for s in sizes2:
            pool_refs[k][...] = _pool(y2, H2, W2, s)
            k += 1
        for s in sizes3:
            pool_refs[k][...] = _pool(y3, H3, W3, s)
            k += 1

    return kernel


# --------------------------- CNNBackbone.forward --------------------------- #

def cnn_backbone_forward(x_nchw, params):
    """Mirrors CNNBackbone.forward (intermediate=True): list of lists of (B, C, -1)."""
    B, _, H, W = x_nchw.shape
    couts = [w.shape[0] for (w, _) in params]
    hs = [H // 2, H // 4, H // 8]
    ws = [W // 2, W // 4, W // 8]
    ms = [B * hs[i] * ws[i] for i in range(3)]
    sizes_lastn = MAXPOOL_SIZES[-LASTN_BLOCKS:]

    # one-time layout prep at the module boundary (everything below is one kernel)
    patches1, _, _ = _im2col_input_patches(x_nchw)
    kpad = patches1.shape[1]
    w1m = _weight_mat_stage1(params[0][0], kpad)
    w2m = _weight_mat_lane(params[1][0])
    w3m = _weight_mat_lane(params[2][0])
    b1r, b2r, b3r = (_bias_row(params[i][1]) for i in range(3))
    t2 = _gather_matrix(B, hs[0], ws[0])          # (9*M2, M1)
    t3 = _gather_matrix(B, hs[1], ws[1])          # (9*M3, M2)

    kernel = _make_fused_kernel(
        B, ((hs[0], ws[0]), (hs[1], ws[1]), (hs[2], ws[2])), sizes_lastn)

    out_shapes = [jax.ShapeDtypeStruct((ms[1], LANE), jnp.float32),
                  jax.ShapeDtypeStruct((ms[2], LANE), jnp.float32)]
    for s in sizes_lastn[0]:
        out_shapes.append(jax.ShapeDtypeStruct((B * s * s, LANE), jnp.float32))
    for s in sizes_lastn[1]:
        out_shapes.append(jax.ShapeDtypeStruct((B * s * s, LANE), jnp.float32))
    out_shapes = tuple(out_shapes)

    inputs = (patches1, w1m, b1r, t2, w2m, b2r, t3, w3m, b3r)
    flops = 2 * (ms[0] * kpad * LANE
                 + t2.shape[0] * t2.shape[1] * LANE + ms[1] * 9 * LANE * LANE
                 + t3.shape[0] * t3.shape[1] * LANE + ms[2] * 9 * LANE * LANE)
    bytes_accessed = (sum(int(np.prod(a.shape)) * a.dtype.itemsize for a in inputs)
                      + sum(int(np.prod(s.shape)) * s.dtype.itemsize for s in out_shapes))

    outs = pl.pallas_call(
        kernel,
        out_shape=out_shapes,
        grid=(1,),
        in_specs=[_full_spec(a.shape) for a in inputs],
        out_specs=tuple(_full_spec(s.shape) for s in out_shapes),
        compiler_params=pltpu.CompilerParams(dimension_semantics=("arbitrary",)),
        cost_estimate=pl.CostEstimate(flops=flops, transcendentals=0,
                                      bytes_accessed=bytes_accessed),
    )(*inputs)

    y2_flat, y3_flat = outs[0], outs[1]
    pool_outs = list(outs[2:])

    def to_bc_flat(flat, hh, ww, c):
        # (B*hh*ww, 128) lane-dense -> module's (B, C, hh*ww) view
        a = flat.reshape(B, hh, ww, LANE)[..., :c]
        return jnp.transpose(a, (0, 3, 1, 2)).reshape(B, c, hh * ww)

    feats = [(y2_flat, hs[1], ws[1], couts[1]), (y3_flat, hs[2], ws[2], couts[2])]
    output_list = []
    k = 0
    for i, (flat, hh, ww, c) in enumerate(feats):
        mps = [to_bc_flat(flat, hh, ww, c)]
        for s in sizes_lastn[i]:
            mps.append(to_bc_flat(pool_outs[k], s, s, c))
            k += 1
        output_list.append(mps)
    return output_list


# ------------------------------- reference --------------------------------- #

def _ref_forward(x, params):
    feats = []
    h = x
    for (w, b) in params:
        y = jax.lax.conv_general_dilated(
            h, w, window_strides=(2, 2), padding=((1, 1), (1, 1)),
            dimension_numbers=("NCHW", "OIHW", "NCHW"))
        h = jnp.maximum(y + b.reshape(1, -1, 1, 1), 0.0)
        feats.append(h)
    intermediate_output = feats[-LASTN_BLOCKS:]
    _sizes = MAXPOOL_SIZES[-LASTN_BLOCKS:]
    out = []
    for i, y in enumerate(intermediate_output):
        B, C, H, W = y.shape
        mps = [y.reshape(B, C, -1)]
        for s in _sizes[i]:
            p = jnp.max(y.reshape(B, C, s, H // s, s, W // s), axis=(3, 5))
            mps.append(p.reshape(B, C, -1))
        out.append(mps)
    return out


# ---------------------------------- main ------------------------------------ #

if __name__ == "__main__":
    key = jax.random.PRNGKey(0)
    kx, kp = jax.random.split(key)

    x = jax.random.normal(kx, (2, 3, 16, 16), jnp.float32)       # NCHW, like PyTorch
    x = x.astype(jnp.bfloat16).astype(jnp.float32)               # bf16-representable input
    params = init_backbone_params(kp)

    out = cnn_backbone_forward(x, params)
    out = jax.block_until_ready(out)

    ref = _ref_forward(x, params)
    for blk_out, blk_ref in zip(out, ref):
        for a, r in zip(blk_out, blk_ref):
            assert a.shape == r.shape, (a.shape, r.shape)
            # bf16 MXU operands (f32 accumulation) => loosened tolerance
            assert jnp.allclose(a, r, atol=2e-2, rtol=2e-2), "mismatch vs reference"

    print("KERNEL_OK")
</pallas_src>

<mosaic_0001>
module attributes {stable_mosaic.version = 11 : i64} {
  func.func @kernel(%arg0: i32, %arg1: memref<128x32xbf16, #tpu.memory_space<vmem>>, %arg2: memref<32x128xbf16, #tpu.memory_space<vmem>>, %arg3: memref<1x128xf32, #tpu.memory_space<vmem>>, %arg4: memref<288x128xbf16, #tpu.memory_space<vmem>>, %arg5: memref<1152x128xbf16, #tpu.memory_space<vmem>>, %arg6: memref<1x128xf32, #tpu.memory_space<vmem>>, %arg7: memref<72x32xbf16, #tpu.memory_space<vmem>>, %arg8: memref<1152x128xbf16, #tpu.memory_space<vmem>>, %arg9: memref<1x128xf32, #tpu.memory_space<vmem>>, %arg10: memref<32x128xf32, #tpu.memory_space<vmem>>, %arg11: memref<8x128xf32, #tpu.memory_space<vmem>>, %arg12: memref<8x128xf32, #tpu.memory_space<vmem>>, %arg13: memref<2x128xf32, #tpu.memory_space<vmem>>, %arg14: memref<2x128xf32, #tpu.memory_space<vmem>>) attributes {dimension_semantics = [#tpu.dimension_semantics<arbitrary>], iteration_bounds = array<i64: 1>, scalar_prefetch = 0 : i64, scratch_operands = 0 : i64, tpu.core_type = #tpu.core_type<tc>, window_params = [{pipeline_mode = #tpu.pipeline_mode<synchronous>, transform_indices = @transform_0, window_bounds = array<i64: 128, 32>}, {pipeline_mode = #tpu.pipeline_mode<synchronous>, transform_indices = @transform_1, window_bounds = array<i64: 32, 128>}, {pipeline_mode = #tpu.pipeline_mode<synchronous>, transform_indices = @transform_2, window_bounds = array<i64: 1, 128>}, {pipeline_mode = #tpu.pipeline_mode<synchronous>, transform_indices = @transform_3, window_bounds = array<i64: 288, 128>}, {pipeline_mode = #tpu.pipeline_mode<synchronous>, transform_indices = @transform_4, window_bounds = array<i64: 1152, 128>}, {pipeline_mode = #tpu.pipeline_mode<synchronous>, transform_indices = @transform_5, window_bounds = array<i64: 1, 128>}, {pipeline_mode = #tpu.pipeline_mode<synchronous>, transform_indices = @transform_6, window_bounds = array<i64: 72, 32>}, {pipeline_mode = #tpu.pipeline_mode<synchronous>, transform_indices = @transform_7, window_bounds = array<i64: 1152, 128>}, {pipeline_mode = #tpu.pipeline_mode<synchronous>, transform_indices = @transform_8, window_bounds = array<i64: 1, 128>}, {pipeline_mode = #tpu.pipeline_mode<synchronous>, transform_indices = @transform_9, window_bounds = array<i64: 32, 128>}, {pipeline_mode = #tpu.pipeline_mode<synchronous>, transform_indices = @transform_10, window_bounds = array<i64: 8, 128>}, {pipeline_mode = #tpu.pipeline_mode<synchronous>, transform_indices = @transform_11, window_bounds = array<i64: 8, 128>}, {pipeline_mode = #tpu.pipeline_mode<synchronous>, transform_indices = @transform_12, window_bounds = array<i64: 2, 128>}, {pipeline_mode = #tpu.pipeline_mode<synchronous>, transform_indices = @transform_13, window_bounds = array<i64: 2, 128>}]} {
    %c0 = arith.constant 0 : index
    %c0_0 = arith.constant 0 : index
    %0 = vector.load %arg1[%c0, %c0_0] : memref<128x32xbf16, #tpu.memory_space<vmem>>, vector<128x32xbf16>
    %c0_1 = arith.constant 0 : index
    %c0_2 = arith.constant 0 : index
    %1 = vector.load %arg2[%c0_1, %c0_2] : memref<32x128xbf16, #tpu.memory_space<vmem>>, vector<32x128xbf16>
    %cst = arith.constant dense<0.000000e+00> : vector<128x128xf32>
    %2 = tpu.matmul %0, %1, %cst {dimension_numbers = #tpu.dot_dimension_numbers<[1], [0], [0], [1], [0, 0, 1, 1], [], []>} : vector<128x32xbf16>, vector<32x128xbf16>, vector<128x128xf32> -> vector<128x128xf32>
    %c0_3 = arith.constant 0 : index
    %c0_4 = arith.constant 0 : index
    %3 = vector.load %arg3[%c0_3, %c0_4] : memref<1x128xf32, #tpu.memory_space<vmem>>, vector<1x128xf32>
    %4 = vector.broadcast %3 : vector<1x128xf32> to vector<128x128xf32>
    %5 = arith.addf %2, %4 : vector<128x128xf32>
    %cst_5 = arith.constant 0.000000e+00 : f32
    %6 = vector.broadcast %cst_5 : f32 to vector<128x128xf32>
    %7 = arith.maximumf %5, %6 : vector<128x128xf32>
    %c0_6 = arith.constant 0 : index
    %c0_7 = arith.constant 0 : index
    %8 = vector.load %arg4[%c0_6, %c0_7] : memref<288x128xbf16, #tpu.memory_space<vmem>>, vector<288x128xbf16>
    %9 = arith.truncf %7 : vector<128x128xf32> to vector<128x128xbf16>
    %cst_8 = arith.constant dense<0.000000e+00> : vector<288x128xf32>
    %10 = tpu.matmul %8, %9, %cst_8 {dimension_numbers = #tpu.dot_dimension_numbers<[1], [0], [0], [1], [0, 0, 1, 1], [], []>} : vector<288x128xbf16>, vector<128x128xbf16>, vector<288x128xf32> -> vector<288x128xf32>
    %11 = vector.extract_strided_slice %10 {offsets = [0, 0], sizes = [32, 128], strides = [1, 1]} : vector<288x128xf32> to vector<32x128xf32>
    %12 = vector.extract_strided_slice %10 {offsets = [32, 0], sizes = [32, 128], strides = [1, 1]} : vector<288x128xf32> to vector<32x128xf32>
    %13 = vector.extract_strided_slice %10 {offsets = [64, 0], sizes = [32, 128], strides = [1, 1]} : vector<288x128xf32> to vector<32x128xf32>
    %14 = vector.extract_strided_slice %10 {offsets = [96, 0], sizes = [32, 128], strides = [1, 1]} : vector<288x128xf32> to vector<32x128xf32>
    %15 = vector.extract_strided_slice %10 {offsets = [128, 0], sizes = [32, 128], strides = [1, 1]} : vector<288x128xf32> to vector<32x128xf32>
    %16 = vector.extract_strided_slice %10 {offsets = [160, 0], sizes = [32, 128], strides = [1, 1]} : vector<288x128xf32> to vector<32x128xf32>
    %17 = vector.extract_strided_slice %10 {offsets = [192, 0], sizes = [32, 128], strides = [1, 1]} : vector<288x128xf32> to vector<32x128xf32>
    %18 = vector.extract_strided_slice %10 {offsets = [224, 0], sizes = [32, 128], strides = [1, 1]} : vector<288x128xf32> to vector<32x128xf32>
    %19 = vector.extract_strided_slice %10 {offsets = [256, 0], sizes = [32, 128], strides = [1, 1]} : vector<288x128xf32> to vector<32x128xf32>
    %20 = tpu.concatenate %11, %12, %13, %14, %15, %16, %17, %18, %19 in 1 : vector<32x128xf32>, vector<32x128xf32>, vector<32x128xf32>, vector<32x128xf32>, vector<32x128xf32>, vector<32x128xf32>, vector<32x128xf32>, vector<32x128xf32>, vector<32x128xf32> -> vector<32x1152xf32>
    %21 = arith.truncf %20 : vector<32x1152xf32> to vector<32x1152xbf16>
    %c0_9 = arith.constant 0 : index
    %c0_10 = arith.constant 0 : index
    %22 = vector.load %arg5[%c0_9, %c0_10] : memref<1152x128xbf16, #tpu.memory_space<vmem>>, vector<1152x128xbf16>
    %cst_11 = arith.constant dense<0.000000e+00> : vector<32x128xf32>
    %23 = tpu.matmul %21, %22, %cst_11 {dimension_numbers = #tpu.dot_dimension_numbers<[1], [0], [0], [1], [0, 0, 1, 1], [], []>} : vector<32x1152xbf16>, vector<1152x128xbf16>, vector<32x128xf32> -> vector<32x128xf32>
    %c0_12 = arith.constant 0 : index
    %c0_13 = arith.constant 0 : index
    %24 = vector.load %arg6[%c0_12, %c0_13] : memref<1x128xf32, #tpu.memory_space<vmem>>, vector<1x128xf32>
    %25 = vector.broadcast %24 : vector<1x128xf32> to vector<32x128xf32>
    %26 = arith.addf %23, %25 : vector<32x128xf32>
    %cst_14 = arith.constant 0.000000e+00 : f32
    %27 = vector.broadcast %cst_14 : f32 to vector<32x128xf32>
    %28 = arith.maximumf %26, %27 : vector<32x128xf32>
    %c0_15 = arith.constant 0 : index
    %c0_16 = arith.constant 0 : index
    %29 = vector.load %arg10[%c0_15, %c0_16] : memref<32x128xf32, #tpu.memory_space<vmem>>, vector<32x128xf32>
    tpu.vector_store %arg10[%c0_15, %c0_16], %28 {strides = array<i32>} : memref<32x128xf32, #tpu.memory_space<vmem>>, vector<32x128xf32>,
    %c0_17 = arith.constant 0 : index
    %c0_18 = arith.constant 0 : index
    %30 = vector.load %arg7[%c0_17, %c0_18] : memref<72x32xbf16, #tpu.memory_space<vmem>>, vector<72x32xbf16>
    %31 = arith.truncf %28 : vector<32x128xf32> to vector<32x128xbf16>
    %cst_19 = arith.constant dense<0.000000e+00> : vector<72x128xf32>
    %32 = tpu.matmul %30, %31, %cst_19 {dimension_numbers = #tpu.dot_dimension_numbers<[1], [0], [0], [1], [0, 0, 1, 1], [], []>} : vector<72x32xbf16>, vector<32x128xbf16>, vector<72x128xf32> -> vector<72x128xf32>
    %33 = vector.extract_strided_slice %32 {offsets = [0, 0], sizes = [8, 128], strides = [1, 1]} : vector<72x128xf32> to vector<8x128xf32>
    %34 = vector.extract_strided_slice %32 {offsets = [8, 0], sizes = [8, 128], strides = [1, 1]} : vector<72x128xf32> to vector<8x128xf32>
    %35 = vector.extract_strided_slice %32 {offsets = [16, 0], sizes = [8, 128], strides = [1, 1]} : vector<72x128xf32> to vector<8x128xf32>
    %36 = vector.extract_strided_slice %32 {offsets = [24, 0], sizes = [8, 128], strides = [1, 1]} : vector<72x128xf32> to vector<8x128xf32>
    %37 = vector.extract_strided_slice %32 {offsets = [32, 0], sizes = [8, 128], strides = [1, 1]} : vector<72x128xf32> to vector<8x128xf32>
    %38 = vector.extract_strided_slice %32 {offsets = [40, 0], sizes = [8, 128], strides = [1, 1]} : vector<72x128xf32> to vector<8x128xf32>
    %39 = vector.extract_strided_slice %32 {offsets = [48, 0], sizes = [8, 128], strides = [1, 1]} : vector<72x128xf32> to vector<8x128xf32>
    %40 = vector.extract_strided_slice %32 {offsets = [56, 0], sizes = [8, 128], strides = [1, 1]} : vector<72x128xf32> to vector<8x128xf32>
    %41 = vector.extract_strided_slice %32 {offsets = [64, 0], sizes = [8, 128], strides = [1, 1]} : vector<72x128xf32> to vector<8x128xf32>
    %42 = tpu.concatenate %33, %34, %35, %36, %37, %38, %39, %40, %41 in 1 : vector<8x128xf32>, vector<8x128xf32>, vector<8x128xf32>, vector<8x128xf32>, vector<8x128xf32>, vector<8x128xf32>, vector<8x128xf32>, vector<8x128xf32>, vector<8x128xf32> -> vector<8x1152xf32>
    %43 = arith.truncf %42 : vector<8x1152xf32> to vector<8x1152xbf16>
    %c0_20 = arith.constant 0 : index
    %c0_21 = arith.constant 0 : index
    %44 = vector.load %arg8[%c0_20, %c0_21] : memref<1152x128xbf16, #tpu.memory_space<vmem>>, vector<1152x128xbf16>
    %cst_22 = arith.constant dense<0.000000e+00> : vector<8x128xf32>
    %45 = tpu.matmul %43, %44, %cst_22 {dimension_numbers = #tpu.dot_dimension_numbers<[1], [0], [0], [1], [0, 0, 1, 1], [], []>} : vector<8x1152xbf16>, vector<1152x128xbf16>, vector<8x128xf32> -> vector<8x128xf32>
    %c0_23 = arith.constant 0 : index
    %c0_24 = arith.constant 0 : index
    %46 = vector.load %arg9[%c0_23, %c0_24] : memref<1x128xf32, #tpu.memory_space<vmem>>, vector<1x128xf32>
    %47 = vector.broadcast %46 : vector<1x128xf32> to vector<8x128xf32>
    %48 = arith.addf %45, %47 : vector<8x128xf32>
    %cst_25 = arith.constant 0.000000e+00 : f32
    %49 = vector.broadcast %cst_25 : f32 to vector<8x128xf32>
    %50 = arith.maximumf %48, %49 : vector<8x128xf32>
    %c0_26 = arith.constant 0 : index
    %c0_27 = arith.constant 0 : index
    %51 = vector.load %arg11[%c0_26, %c0_27] : memref<8x128xf32, #tpu.memory_space<vmem>>, vector<8x128xf32>
    tpu.vector_store %arg11[%c0_26, %c0_27], %50 {strides = array<i32>} : memref<8x128xf32, #tpu.memory_space<vmem>>, vector<8x128xf32>,
    %52 = vector.extract_strided_slice %28 {offsets = [0, 0], sizes = [1, 128], strides = [1, 1]} : vector<32x128xf32> to vector<1x128xf32>
    %53 = vector.extract_strided_slice %28 {offsets = [1, 0], sizes = [1, 128], strides = [1, 1]} : vector<32x128xf32> to vector<1x128xf32>
    %54 = arith.maximumf %52, %53 : vector<1x128xf32>
    %55 = vector.extract_strided_slice %28 {offsets = [4, 0], sizes = [1, 128], strides = [1, 1]} : vector<32x128xf32> to vector<1x128xf32>
    %56 = arith.maximumf %54, %55 : vector<1x128xf32>
    %57 = vector.extract_strided_slice %28 {offsets = [5, 0], sizes = [1, 128], strides = [1, 1]} : vector<32x128xf32> to vector<1x128xf32>
    %58 = arith.maximumf %56, %57 : vector<1x128xf32>
    %59 = vector.extract_strided_slice %28 {offsets = [2, 0], sizes = [1, 128], strides = [1, 1]} : vector<32x128xf32> to vector<1x128xf32>
    %60 = vector.extract_strided_slice %28 {offsets = [3, 0], sizes = [1, 128], strides = [1, 1]} : vector<32x128xf32> to vector<1x128xf32>
    %61 = arith.maximumf %59, %60 : vector<1x128xf32>
    %62 = vector.extract_strided_slice %28 {offsets = [6, 0], sizes = [1, 128], strides = [1, 1]} : vector<32x128xf32> to vector<1x128xf32>
    %63 = arith.maximumf %61, %62 : vector<1x128xf32>
    %64 = vector.extract_strided_slice %28 {offsets = [7, 0], sizes = [1, 128], strides = [1, 1]} : vector<32x128xf32> to vector<1x128xf32>
    %65 = arith.maximumf %63, %64 : vector<1x128xf32>
    %66 = vector.extract_strided_slice %28 {offsets = [8, 0], sizes = [1, 128], strides = [1, 1]} : vector<32x128xf32> to vector<1x128xf32>
    %67 = vector.extract_strided_slice %28 {offsets = [9, 0], sizes = [1, 128], strides = [1, 1]} : vector<32x128xf32> to vector<1x128xf32>
    %68 = arith.maximumf %66, %67 : vector<1x128xf32>
    %69 = vector.extract_strided_slice %28 {offsets = [12, 0], sizes = [1, 128], strides = [1, 1]} : vector<32x128xf32> to vector<1x128xf32>
    %70 = arith.maximumf %68, %69 : vector<1x128xf32>
    %71 = vector.extract_strided_slice %28 {offsets = [13, 0], sizes = [1, 128], strides = [1, 1]} : vector<32x128xf32> to vector<1x128xf32>
    %72 = arith.maximumf %70, %71 : vector<1x128xf32>
    %73 = vector.extract_strided_slice %28 {offsets = [10, 0], sizes = [1, 128], strides = [1, 1]} : vector<32x128xf32> to vector<1x128xf32>
    %74 = vector.extract_strided_slice %28 {offsets = [11, 0], sizes = [1, 128], strides = [1, 1]} : vector<32x128xf32> to vector<1x128xf32>
    %75 = arith.maximumf %73, %74 : vector<1x128xf32>
    %76 = vector.extract_strided_slice %28 {offsets = [14, 0], sizes = [1, 128], strides = [1, 1]} : vector<32x128xf32> to vector<1x128xf32>
    %77 = arith.maximumf %75, %76 : vector<1x128xf32>
    %78 = vector.extract_strided_slice %28 {offsets = [15, 0], sizes = [1, 128], strides = [1, 1]} : vector<32x128xf32> to vector<1x128xf32>
    %79 = arith.maximumf %77, %78 : vector<1x128xf32>
    %80 = vector.extract_strided_slice %28 {offsets = [16, 0], sizes = [1, 128], strides = [1, 1]} : vector<32x128xf32> to vector<1x128xf32>
    %81 = vector.extract_strided_slice %28 {offsets = [17, 0], sizes = [1, 128], strides = [1, 1]} : vector<32x128xf32> to vector<1x128xf32>
    %82 = arith.maximumf %80, %81 : vector<1x128xf32>
    %83 = vector.extract_strided_slice %28 {offsets = [20, 0], sizes = [1, 128], strides = [1, 1]} : vector<32x128xf32> to vector<1x128xf32>
    %84 = arith.maximumf %82, %83 : vector<1x128xf32>
    %85 = vector.extract_strided_slice %28 {offsets = [21, 0], sizes = [1, 128], strides = [1, 1]} : vector<32x128xf32> to vector<1x128xf32>
    %86 = arith.maximumf %84, %85 : vector<1x128xf32>
    %87 = vector.extract_strided_slice %28 {offsets = [18, 0], sizes = [1, 128], strides = [1, 1]} : vector<32x128xf32> to vector<1x128xf32>
    %88 = vector.extract_strided_slice %28 {offsets = [19, 0], sizes = [1, 128], strides = [1, 1]} : vector<32x128xf32> to vector<1x128xf32>
    %89 = arith.maximumf %87, %88 : vector<1x128xf32>
    %90 = vector.extract_strided_slice %28 {offsets = [22, 0], sizes = [1, 128], strides = [1, 1]} : vector<32x128xf32> to vector<1x128xf32>
    %91 = arith.maximumf %89, %90 : vector<1x128xf32>
    %92 = vector.extract_strided_slice %28 {offsets = [23, 0], sizes = [1, 128], strides = [1, 1]} : vector<32x128xf32> to vector<1x128xf32>
    %93 = arith.maximumf %91, %92 : vector<1x128xf32>
    %94 = vector.extract_strided_slice %28 {offsets = [24, 0], sizes = [1, 128], strides = [1, 1]} : vector<32x128xf32> to vector<1x128xf32>
    %95 = vector.extract_strided_slice %28 {offsets = [25, 0], sizes = [1, 128], strides = [1, 1]} : vector<32x128xf32> to vector<1x128xf32>
    %96 = arith.maximumf %94, %95 : vector<1x128xf32>
    %97 = vector.extract_strided_slice %28 {offsets = [28, 0], sizes = [1, 128], strides = [1, 1]} : vector<32x128xf32> to vector<1x128xf32>
    %98 = arith.maximumf %96, %97 : vector<1x128xf32>
    %99 = vector.extract_strided_slice %28 {offsets = [29, 0], sizes = [1, 128], strides = [1, 1]} : vector<32x128xf32> to vector<1x128xf32>
    %100 = arith.maximumf %98, %99 : vector<1x128xf32>
    %101 = vector.extract_strided_slice %28 {offsets = [26, 0], sizes = [1, 128], strides = [1, 1]} : vector<32x128xf32> to vector<1x128xf32>
    %102 = vector.extract_strided_slice %28 {offsets = [27, 0], sizes = [1, 128], strides = [1, 1]} : vector<32x128xf32> to vector<1x128xf32>
    %103 = arith.maximumf %101, %102 : vector<1x128xf32>
    %104 = vector.extract_strided_slice %28 {offsets = [30, 0], sizes = [1, 128], strides = [1, 1]} : vector<32x128xf32> to vector<1x128xf32>
    %105 = arith.maximumf %103, %104 : vector<1x128xf32>
    %106 = vector.extract_strided_slice %28 {offsets = [31, 0], sizes = [1, 128], strides = [1, 1]} : vector<32x128xf32> to vector<1x128xf32>
    %107 = arith.maximumf %105, %106 : vector<1x128xf32>
    %108 = tpu.concatenate %58, %65, %72, %79, %86, %93, %100, %107 in 0 : vector<1x128xf32>, vector<1x128xf32>, vector<1x128xf32>, vector<1x128xf32>, vector<1x128xf32>, vector<1x128xf32>, vector<1x128xf32>, vector<1x128xf32> -> vector<8x128xf32>
    %c0_28 = arith.constant 0 : index
    %c0_29 = arith.constant 0 : index
    %109 = vector.load %arg12[%c0_28, %c0_29] : memref<8x128xf32, #tpu.memory_space<vmem>>, vector<8x128xf32>
    tpu.vector_store %arg12[%c0_28, %c0_29], %108 {strides = array<i32>} : memref<8x128xf32, #tpu.memory_space<vmem>>, vector<8x128xf32>,
    %110 = vector.extract_strided_slice %28 {offsets = [0, 0], sizes = [1, 128], strides = [1, 1]} : vector<32x128xf32> to vector<1x128xf32>
    %111 = vector.extract_strided_slice %28 {offsets = [1, 0], sizes = [1, 128], strides = [1, 1]} : vector<32x128xf32> to vector<1x128xf32>
    %112 = arith.maximumf %110, %111 : vector<1x128xf32>
    %113 = vector.extract_strided_slice %28 {offsets = [2, 0], sizes = [1, 128], strides = [1, 1]} : vector<32x128xf32> to vector<1x128xf32>
    %114 = arith.maximumf %112, %113 : vector<1x128xf32>
    %115 = vector.extract_strided_slice %28 {offsets = [3, 0], sizes = [1, 128], strides = [1, 1]} : vector<32x128xf32> to vector<1x128xf32>
    %116 = arith.maximumf %114, %115 : vector<1x128xf32>
    %117 = vector.extract_strided_slice %28 {offsets = [4, 0], sizes = [1, 128], strides = [1, 1]} : vector<32x128xf32> to vector<1x128xf32>
    %118 = arith.maximumf %116, %117 : vector<1x128xf32>
    %119 = vector.extract_strided_slice %28 {offsets = [5, 0], sizes = [1, 128], strides = [1, 1]} : vector<32x128xf32> to vector<1x128xf32>
    %120 = arith.maximumf %118, %119 : vector<1x128xf32>
    %121 = vector.extract_strided_slice %28 {offsets = [6, 0], sizes = [1, 128], strides = [1, 1]} : vector<32x128xf32> to vector<1x128xf32>
    %122 = arith.maximumf %120, %121 : vector<1x128xf32>
    %123 = vector.extract_strided_slice %28 {offsets = [7, 0], sizes = [1, 128], strides = [1, 1]} : vector<32x128xf32> to vector<1x128xf32>
    %124 = arith.maximumf %122, %123 : vector<1x128xf32>
    %125 = vector.extract_strided_slice %28 {offsets = [8, 0], sizes = [1, 128], strides = [1, 1]} : vector<32x128xf32> to vector<1x128xf32>
    %126 = arith.maximumf %124, %125 : vector<1x128xf32>
    %127 = vector.extract_strided_slice %28 {offsets = [9, 0], sizes = [1, 128], strides = [1, 1]} : vector<32x128xf32> to vector<1x128xf32>
    %128 = arith.maximumf %126, %127 : vector<1x128xf32>
    %129 = vector.extract_strided_slice %28 {offsets = [10, 0], sizes = [1, 128], strides = [1, 1]} : vector<32x128xf32> to vector<1x128xf32>
    %130 = arith.maximumf %128, %129 : vector<1x128xf32>
    %131 = vector.extract_strided_slice %28 {offsets = [11, 0], sizes = [1, 128], strides = [1, 1]} : vector<32x128xf32> to vector<1x128xf32>
    %132 = arith.maximumf %130, %131 : vector<1x128xf32>
    %133 = vector.extract_strided_slice %28 {offsets = [12, 0], sizes = [1, 128], strides = [1, 1]} : vector<32x128xf32> to vector<1x128xf32>
    %134 = arith.maximumf %132, %133 : vector<1x128xf32>
    %135 = vector.extract_strided_slice %28 {offsets = [13, 0], sizes = [1, 128], strides = [1, 1]} : vector<32x128xf32> to vector<1x128xf32>
    %136 = arith.maximumf %134, %135 : vector<1x128xf32>
    %137 = vector.extract_strided_slice %28 {offsets = [14, 0], sizes = [1, 128], strides = [1, 1]} : vector<32x128xf32> to vector<1x128xf32>
    %138 = arith.maximumf %136, %137 : vector<1x128xf32>
    %139 = vector.extract_strided_slice %28 {offsets = [15, 0], sizes = [1, 128], strides = [1, 1]} : vector<32x128xf32> to vector<1x128xf32>
    %140 = arith.maximumf %138, %139 : vector<1x128xf32>
    %141 = vector.extract_strided_slice %28 {offsets = [16, 0], sizes = [1, 128], strides = [1, 1]} : vector<32x128xf32> to vector<1x128xf32>
    %142 = vector.extract_strided_slice %28 {offsets = [17, 0], sizes = [1, 128], strides = [1, 1]} : vector<32x128xf32> to vector<1x128xf32>
    %143 = arith.maximumf %141, %142 : vector<1x128xf32>
    %144 = vector.extract_strided_slice %28 {offsets = [18, 0], sizes = [1, 128], strides = [1, 1]} : vector<32x128xf32> to vector<1x128xf32>
    %145 = arith.maximumf %143, %144 : vector<1x128xf32>
    %146 = vector.extract_strided_slice %28 {offsets = [19, 0], sizes = [1, 128], strides = [1, 1]} : vector<32x128xf32> to vector<1x128xf32>
    %147 = arith.maximumf %145, %146 : vector<1x128xf32>
    %148 = vector.extract_strided_slice %28 {offsets = [20, 0], sizes = [1, 128], strides = [1, 1]} : vector<32x128xf32> to vector<1x128xf32>
    %149 = arith.maximumf %147, %148 : vector<1x128xf32>
    %150 = vector.extract_strided_slice %28 {offsets = [21, 0], sizes = [1, 128], strides = [1, 1]} : vector<32x128xf32> to vector<1x128xf32>
    %151 = arith.maximumf %149, %150 : vector<1x128xf32>
    %152 = vector.extract_strided_slice %28 {offsets = [22, 0], sizes = [1, 128], strides = [1, 1]} : vector<32x128xf32> to vector<1x128xf32>
    %153 = arith.maximumf %151, %152 : vector<1x128xf32>
    %154 = vector.extract_strided_slice %28 {offsets = [23, 0], sizes = [1, 128], strides = [1, 1]} : vector<32x128xf32> to vector<1x128xf32>
    %155 = arith.maximumf %153, %154 : vector<1x128xf32>
    %156 = vector.extract_strided_slice %28 {offsets = [24, 0], sizes = [1, 128], strides = [1, 1]} : vector<32x128xf32> to vector<1x128xf32>
    %157 = arith.maximumf %155, %156 : vector<1x128xf32>
    %158 = vector.extract_strided_slice %28 {offsets = [25, 0], sizes = [1, 128], strides = [1, 1]} : vector<32x128xf32> to vector<1x128xf32>
    %159 = arith.maximumf %157, %158 : vector<1x128xf32>
    %160 = vector.extract_strided_slice %28 {offsets = [26, 0], sizes = [1, 128], strides = [1, 1]} : vector<32x128xf32> to vector<1x128xf32>
    %161 = arith.maximumf %159, %160 : vector<1x128xf32>
    %162 = vector.extract_strided_slice %28 {offsets = [27, 0], sizes = [1, 128], strides = [1, 1]} : vector<32x128xf32> to vector<1x128xf32>
    %163 = arith.maximumf %161, %162 : vector<1x128xf32>
    %164 = vector.extract_strided_slice %28 {offsets = [28, 0], sizes = [1, 128], strides = [1, 1]} : vector<32x128xf32> to vector<1x128xf32>
    %165 = arith.maximumf %163, %164 : vector<1x128xf32>
    %166 = vector.extract_strided_slice %28 {offsets = [29, 0], sizes = [1, 128], strides = [1, 1]} : vector<32x128xf32> to vector<1x128xf32>
    %167 = arith.maximumf %165, %166 : vector<1x128xf32>
    %168 = vector.extract_strided_slice %28 {offsets = [30, 0], sizes = [1, 128], strides = [1, 1]} : vector<32x128xf32> to vector<1x128xf32>
    %169 = arith.maximumf %167, %168 : vector<1x128xf32>
    %170 = vector.extract_strided_slice %28 {offsets = [31, 0], sizes = [1, 128], strides = [1, 1]} : vector<32x128xf32> to vector<1x128xf32>
    %171 = arith.maximumf %169, %170 : vector<1x128xf32>
    %172 = tpu.concatenate %140, %171 in 0 : vector<1x128xf32>, vector<1x128xf32> -> vector<2x128xf32>
    %c0_30 = arith.constant 0 : index
    %c0_31 = arith.constant 0 : index
    %173 = vector.load %arg13[%c0_30, %c0_31] : memref<2x128xf32, #tpu.memory_space<vmem>>, vector<2x128xf32>
    tpu.vector_store %arg13[%c0_30, %c0_31], %172 {strides = array<i32>} : memref<2x128xf32, #tpu.memory_space<vmem>>, vector<2x128xf32>,
    %174 = vector.extract_strided_slice %50 {offsets = [0, 0], sizes = [1, 128], strides = [1, 1]} : vector<8x128xf32> to vector<1x128xf32>
    %175 = vector.extract_strided_slice %50 {offsets = [1, 0], sizes = [1, 128], strides = [1, 1]} : vector<8x128xf32> to vector<1x128xf32>
    %176 = arith.maximumf %174, %175 : vector<1x128xf32>
    %177 = vector.extract_strided_slice %50 {offsets = [2, 0], sizes = [1, 128], strides = [1, 1]} : vector<8x128xf32> to vector<1x128xf32>
    %178 = arith.maximumf %176, %177 : vector<1x128xf32>
    %179 = vector.extract_strided_slice %50 {offsets = [3, 0], sizes = [1, 128], strides = [1, 1]} : vector<8x128xf32> to vector<1x128xf32>
    %180 = arith.maximumf %178, %179 : vector<1x128xf32>
    %181 = vector.extract_strided_slice %50 {offsets = [4, 0], sizes = [1, 128], strides = [1, 1]} : vector<8x128xf32> to vector<1x128xf32>
    %182 = vector.extract_strided_slice %50 {offsets = [5, 0], sizes = [1, 128], strides = [1, 1]} : vector<8x128xf32> to vector<1x128xf32>
    %183 = arith.maximumf %181, %182 : vector<1x128xf32>
    %184 = vector.extract_strided_slice %50 {offsets = [6, 0], sizes = [1, 128], strides = [1, 1]} : vector<8x128xf32> to vector<1x128xf32>
    %185 = arith.maximumf %183, %184 : vector<1x128xf32>
    %186 = vector.extract_strided_slice %50 {offsets = [7, 0], sizes = [1, 128], strides = [1, 1]} : vector<8x128xf32> to vector<1x128xf32>
    %187 = arith.maximumf %185, %186 : vector<1x128xf32>
    %188 = tpu.concatenate %180, %187 in 0 : vector<1x128xf32>, vector<1x128xf32> -> vector<2x128xf32>
    %c0_32 = arith.constant 0 : index
    %c0_33 = arith.constant 0 : index
    %189 = vector.load %arg14[%c0_32, %c0_33] : memref<2x128xf32, #tpu.memory_space<vmem>>, vector<2x128xf32>
    tpu.vector_store %arg14[%c0_32, %c0_33], %188 {strides = array<i32>} : memref<2x128xf32, #tpu.memory_space<vmem>>, vector<2x128xf32>,
    return
  }
  func.func @transform_0(%arg0: i32) -> (i32, i32) {
    %c0_i32 = arith.constant 0 : i32
    %c0_i32_0 = arith.constant 0 : i32
    %c0_i32_1 = arith.constant 0 : i32
    return %c0_i32, %c0_i32_0 : i32, i32
  }
  func.func @transform_1(%arg0: i32) -> (i32, i32) {
    %c0_i32 = arith.constant 0 : i32
    %c0_i32_0 = arith.constant 0 : i32
    %c0_i32_1 = arith.constant 0 : i32
    return %c0_i32, %c0_i32_0 : i32, i32
  }
  func.func @transform_2(%arg0: i32) -> (i32, i32) {
    %c0_i32 = arith.constant 0 : i32
    %c0_i32_0 = arith.constant 0 : i32
    %c0_i32_1 = arith.constant 0 : i32
    return %c0_i32, %c0_i32_0 : i32, i32
  }
  func.func @transform_3(%arg0: i32) -> (i32, i32) {
    %c0_i32 = arith.constant 0 : i32
    %c0_i32_0 = arith.constant 0 : i32
    %c0_i32_1 = arith.constant 0 : i32
    return %c0_i32, %c0_i32_0 : i32, i32
  }
  func.func @transform_4(%arg0: i32) -> (i32, i32) {
    %c0_i32 = arith.constant 0 : i32
    %c0_i32_0 = arith.constant 0 : i32
    %c0_i32_1 = arith.constant 0 : i32
    return %c0_i32, %c0_i32_0 : i32, i32
  }
  func.func @transform_5(%arg0: i32) -> (i32, i32) {
    %c0_i32 = arith.constant 0 : i32
    %c0_i32_0 = arith.constant 0 : i32
    %c0_i32_1 = arith.constant 0 : i32
    return %c0_i32, %c0_i32_0 : i32, i32
  }
  func.func @transform_6(%arg0: i32) -> (i32, i32) {
    %c0_i32 = arith.constant 0 : i32
    %c0_i32_0 = arith.constant 0 : i32
    %c0_i32_1 = arith.constant 0 : i32
    return %c0_i32, %c0_i32_0 : i32, i32
  }
  func.func @transform_7(%arg0: i32) -> (i32, i32) {
    %c0_i32 = arith.constant 0 : i32
    %c0_i32_0 = arith.constant 0 : i32
    %c0_i32_1 = arith.constant 0 : i32
    return %c0_i32, %c0_i32_0 : i32, i32
  }
  func.func @transform_8(%arg0: i32) -> (i32, i32) {
    %c0_i32 = arith.constant 0 : i32
    %c0_i32_0 = arith.constant 0 : i32
    %c0_i32_1 = arith.constant 0 : i32
    return %c0_i32, %c0_i32_0 : i32, i32
  }
  func.func @transform_9(%arg0: i32) -> (i32, i32) {
    %c0_i32 = arith.constant 0 : i32
    %c0_i32_0 = arith.constant 0 : i32
    %c0_i32_1 = arith.constant 0 : i32
    return %c0_i32, %c0_i32_0 : i32, i32
  }
  func.func @transform_10(%arg0: i32) -> (i32, i32) {
    %c0_i32 = arith.constant 0 : i32
    %c0_i32_0 = arith.constant 0 : i32
    %c0_i32_1 = arith.constant 0 : i32
    return %c0_i32, %c0_i32_0 : i32, i32
  }
  func.func @transform_11(%arg0: i32) -> (i32, i32) {
    %c0_i32 = arith.constant 0 : i32
    %c0_i32_0 = arith.constant 0 : i32
    %c0_i32_1 = arith.constant 0 : i32
    return %c0_i32, %c0_i32_0 : i32, i32
  }
  func.func @transform_12(%arg0: i32) -> (i32, i32) {
    %c0_i32 = arith.constant 0 : i32
    %c0_i32_0 = arith.constant 0 : i32
    %c0_i32_1 = arith.constant 0 : i32
    return %c0_i32, %c0_i32_0 : i32, i32
  }
  func.func @transform_13(%arg0: i32) -> (i32, i32) {
    %c0_i32 = arith.constant 0 : i32
    %c0_i32_0 = arith.constant 0 : i32
    %c0_i32_1 = arith.constant 0 : i32
    return %c0_i32, %c0_i32_0 : i32, i32
  }
}

</mosaic_0001>

<bundles_post_ra>
// kernel: tpu_custom_call.1
= control target key start
LH: loop header
LB: loop body
LE: loop exit
PB: predicated region body
PF: predicated region fallthrough
CT: control target
= control target key end

     0   :  { %19 = vsyncpa [#allocation3], 0  ;;  %s3886_s0 = inlined_call_operand.vmem [shape: bf16[128,32], index: 0, kind: input, shape index: {}]   ;;  %s3887_s1 = inlined_call_operand.vmem [shape: bf16[32,128], index: 1, kind: input, shape index: {}]   ;;  %s3888_s2 = inlined_call_operand.vmem [shape: f32[1,128], index: 2, kind: input, shape index: {}]   ;;  %s3889_s3 = inlined_call_operand.hbm [shape: bf16[288,128], index: 3, kind: input, shape index: {}]   ;;  %s3890_s4 = inlined_call_operand.hbm [shape: bf16[1152,128], index: 4, kind: input, shape index: {}]   ;;  %s3891_s5 = inlined_call_operand.vmem [shape: f32[1,128], index: 5, kind: input, shape index: {}]   ;;  %s3892_s6 = inlined_call_operand.vmem [shape: bf16[72,32], index: 6, kind: input, shape index: {}]   ;;  %s3893_s7 = inlined_call_operand.hbm [shape: bf16[1152,128], index: 7, kind: input, shape index: {}]   ;;  %s3894_s8 = inlined_call_operand.vmem [shape: f32[1,128], index: 8, kind: input, shape index: {}]   ;;  %s3895_s9 = inlined_call_operand.hbm [shape: f32[32,128], index: 9, kind: output, shape index: {0}]   ;;  %s3896_s10 = inlined_call_operand.hbm [shape: f32[8,128], index: 10, kind: output, shape index: {1}]   ;;  %s3897_s11 = inlined_call_operand.hbm [shape: f32[8,128], index: 11, kind: output, shape index: {2}]   ;;  %s3898_s12 = inlined_call_operand.hbm [shape: f32[2,128], index: 12, kind: output, shape index: {3}]   ;;  %s3899_s13 = inlined_call_operand.hbm [shape: f32[2,128], index: 13, kind: output, shape index: {4}]  }
   0x1   :  { %20 = vsyncpa [#allocation6], 0 }
   0x2   :  { %21 = vsyncpa [#allocation4], 0 }
   0x3   :  { %22 = vsyncpa [#allocation10], 0 }
   0x4   :  { %23 = vsyncpa [#allocation13], 0  ;;  %s3574_s25 = smov [#allocation5]   ;;  %s3575_s27 = smov [#allocation2]  }
   0x5   :  { %s47_s26 = sshll.u32 %s3574_s25, 4  ;;  %s35_s28 = sshll.u32 %s3575_s27, 4  ;;  %s48_s26 = int_to_ptr.vmem [resolvable:$true] %s47_s26  ;;  %s36_s28 = int_to_ptr.vmem [resolvable:$true] %s35_s28 }
   0x6   :  { %s3412_s29 = scalar_lea.vmem %s48_s26, 9216  ;;  %p3417_p1 = scmp.lt.s32.totalorder %s48_s26, %s48_s26 }
   0x7   :  { %p3413_p0 = scmp.ne.s32.totalorder %s48_s26, %s3412_s29  ;;  %p3418_p2 = scmp.lt.s32.totalorder %s3412_s29, %s3412_s29 }
   0x9   :  { %p3419_p3 = por %p3418_p2, %p3417_p1 }
   0xb   :  { %p3420_p4 = pnand %p3419_p3, %p3413_p0 }
   0xd   :  { %3423 = shalt.err (!%p3420_p4)
}
   0xe   :  { %s3576_s30 = smov 64   ;;  %s3577_s14 = smov 4  }
   0xf   :  { %53 = dma.hbm_to_vmem [thread:$0]  %s3890_s4, 9216, %s48_s26, [#allocation6], %s3576_s30, %s3576_s30, %s3577_s14  }
  0x10   :  { %s3432_s17 = scalar_lea.vmem %s36_s28, 2304  ;;  %p3437_p6 = scmp.lt.s32.totalorder %s36_s28, %s36_s28 }
  0x11   :  { %p3433_p5 = scmp.ne.s32.totalorder %s36_s28, %s3432_s17  ;;  %p3438_p7 = scmp.lt.s32.totalorder %s3432_s17, %s3432_s17 }
  0x13   :  { %p3439_p8 = por %p3438_p7, %p3437_p6 }
  0x15   :  { %p3440_p9 = pnand %p3439_p8, %p3433_p5 }
  0x17   :  { %3443 = shalt.err (!%p3440_p9)
}
  0x18   :  { %41 = dma.hbm_to_vmem [thread:$0]  %s3889_s3, 2304, %s36_s28, [#allocation3], %s3576_s30, %s3576_s30, %s3577_s14  }
  0x19   :  { %s3578_s20 = smov [#allocation7]  }
  0x1a   :  { %s63_s21 = sshll.u32 %s3578_s20, 4  ;;  %s64_s21 = int_to_ptr.vmem [resolvable:$true] %s63_s21 }
  0x1b   :  { %s3452_s22 = scalar_lea.vmem %s64_s21, 9216  ;;  %p3457_p11 = scmp.lt.s32.totalorder %s64_s21, %s64_s21 }
  0x1c   :  { %p3453_p10 = scmp.ne.s32.totalorder %s64_s21, %s3452_s22  ;;  %p3458_p12 = scmp.lt.s32.totalorder %s3452_s22, %s3452_s22 }
  0x1e   :  { %p3459_p13 = por %p3458_p12, %p3457_p11 }
  0x20   :  { %p3460_p0 = pnand %p3459_p13, %p3453_p10 }
  0x22   :  { %3463 = shalt.err (!%p3460_p0)
}
  0x23   :  { %69 = dma.hbm_to_vmem [thread:$0]  %s3893_s7, 9216, %s64_s21, [#allocation6], %s3576_s30, %s3576_s30, %s3577_s14  }
  0x24   :  { %3564 = dma.done.wait [#allocation3], 2304  }
  0x25   :  { %3565 = vsyncadd [#allocation3], 4294964992 }
  0x26   :  { %3566 = dma.done.wait [#allocation6], 18432  }
  0x27   :  { %3567 = vsyncadd [#allocation6], 4294948864  ;;  %v3227_v0 = vld [vmem:[%s3887_s1 + $0x8] sm:$0xff]   ;;  %v3228_v1 = vld [vmem:[%s3887_s1] sm:$0xff]   ;;  %vm161_vm0 = vcmask 261120   ;;  %vm3580_vm1 = vmmov 0  }
  0x28   :  { %3077 = vmatprep.subr.bf16.mxu1 %v3227_v0  ;;  %v3229_v2 = vld [vmem:[%s3886_s0] sm:$0xff]   ;;  %v3230_v3 = vld [vmem:[%s3886_s0 + $0x8] sm:$0xff]   ;;  %v3231_v4 = vld [vmem:[%s3886_s0 + $0x10] sm:$0xff]   ;;  %vm2455_vm2 = vcmask 1040384   ;;  %vm2457_vm3 = vcmask 1041408   ;;  %vm2459_vm4 = vcmask 1042432  }
  0x29   :  { %3078 = vmatpush3.bf16.msra.mxu1 %v3227_v0  ;;  %3081 = vmatprep.mubr.msk.bf16.mxu1 %vm161_vm0, %v3229_v2  ;;  %v3232_v5 = vld [vmem:[%s3886_s0 + $0x18] sm:$0xff]   ;;  %v3233_v6 = vld [vmem:[%s3886_s0 + $0x20] sm:$0xff]   ;;  %v3234_v7 = vld [vmem:[%s3886_s0 + $0x28] sm:$0xff]   ;;  %vm2461_vm5 = vcmask 1043456   ;;  %vm2463_vm6 = vcmask 1044480   ;;  %vm2465_vm7 = vcmask 1045504  }
  0x2a   :  { %3079 = vmatprep.subr.bf16.mxu1 %v3228_v1  ;;  %v3235_v8 = vld [vmem:[%s3886_s0 + $0x30] sm:$0xff]   ;;  %v3236_v9 = vld [vmem:[%s3886_s0 + $0x38] sm:$0xff]   ;;  %v3237_v10 = vld [vmem:[#allocation2] sm:$0xff]   ;;  %vm2467_vm8 = vcmask 1046528  }
  0x2b   :  { %v3255_v13 = vld [vmem:[#allocation5 + $0x78] sm:$0xff]   ;;  %v3257_v15 = vld [vmem:[#allocation5 + $0x70] sm:$0xff]   ;;  %v3259_v19 = vld [vmem:[#allocation5 + $0x68] sm:$0xff]  }
  0x2c   :  { %v3256_v14 = vld [vmem:[#allocation5 + $0x38] sm:$0xff]   ;;  %2851 = vmatprep.subr.bf16.mxu0 %v3255_v13  ;;  %v3258_v18 = vld [vmem:[#allocation5 + $0x30] sm:$0xff]   ;;  %v3260_v22 = vld [vmem:[#allocation5 + $0x28] sm:$0xff]  }
  0x2d   :  { %3080 = vmatpush3.bf16.msra.mxu1 %v3228_v1  ;;  %2852 = vmatpush3.bf16.msra.mxu0 %v3256_v14  ;;  %v3261_v23 = vld [vmem:[#allocation5 + $0x60] sm:$0xff]   ;;  %v2622_v32 = vld [vmem:[%s3888_s2] ss:$0 sm:$0xff] }
  0x2e   :  { %2853 = vmatprep.subr.bf16.mxu0 %v3257_v15  ;;  %v3262_v26 = vld [vmem:[#allocation5 + $0x20] sm:$0xff]   ;;  %v3240_v15 = vld [vmem:[#allocation2 + $0x18] sm:$0xff]  }
  0x2f   :  { %v3239_v14 = vld [vmem:[#allocation2 + $0x10] sm:$0xff]  }
  0x30   :  { %3082 = vmatmul.mubr.msk.bf16.vlgmr.msra.gmra.mxu1 %vm161_vm0, %v3230_v3 }
  0x31   :  { %3085 = vmatprep.mubr.msk.bf16.mxu1 %vm161_vm0, %v3231_v4  ;;  %2854 = vmatpush3.bf16.msra.mxu0 %v3258_v18  ;;  %v3244_v18 = vld [vmem:[#allocation2 + $0x38] sm:$0xff]  }
  0x32   :  { %2855 = vmatprep.subr.bf16.mxu0 %v3259_v19  ;;  %v3245_v19 = vld [vmem:[#allocation2 + $0x40] sm:$0xff]  }
  0x35   :  { %2856 = vmatpush3.bf16.msra.mxu0 %v3260_v22  ;;  %v3248_v22 = vld [vmem:[#allocation2 + $0x58] sm:$0xff]  }
  0x36   :  { %2857 = vmatprep.subr.bf16.mxu0 %v3261_v23  ;;  %v3249_v23 = vld [vmem:[#allocation2 + $0x60] sm:$0xff]  }
  0x38   :  { %3086 = vmatmul.mubr.msk.bf16.gmra.mxu1 %vm161_vm0, %v3232_v5 }
  0x39   :  { %3089 = vmatprep.mubr.msk.bf16.mxu1 %vm161_vm0, %v3233_v6  ;;  %2858 = vmatpush3.bf16.msra.mxu0 %v3262_v26  ;;  %v3252_v26 = vld [vmem:[#allocation2 + $0x78] sm:$0xff]  }
  0x40   :  { %3090 = vmatmul.mubr.msk.bf16.gmra.mxu1 %vm161_vm0, %v3234_v7 }
  0x41   :  { %3093 = vmatprep.mubr.msk.bf16.mxu1 %vm161_vm0, %v3235_v8 }
  0x48   :  { %3094 = vmatmul.mubr.msk.bf16.gmra.mxu1 %vm161_vm0, %v3236_v9 }
  0x49   :  { %3113 = vmatprep.mubr.bf16.mxu1 %v3237_v10 }
  0xf0   :  { %v3705_v11 = vpop.f32.mrf.mxu1 }
  0xf1   :  { %v229_v1 = vadd.f32 %v3705_v11, %v2622_v32  ;;  %v3238_v11 = vld [vmem:[#allocation2 + $0x8] sm:$0xff]  }
  0xf2   :  { %v3707_v12 = vpop.f32.mrf.mxu1 }
  0xf3   :  { %v285_v6 = vmax.f32 %v229_v1, 0.0  ;;  %v221_v7 = vadd.f32 %v2622_v32, %v3707_v12  ;;  %v3243_v12 = vld [vmem:[#allocation2 + $0x30] sm:$0xff]  }
  0xf4   :  { %v3084_v16 = vpop.f32.mrf.mxu1 }
  0xf5   :  { %v232_v62 = vadd.f32 %v3084_v16, %v2622_v32  ;;  %v283_v10 = vmax.f32 %v221_v7, 0.0  ;;  %v3241_v16 = vld [vmem:[#allocation2 + $0x20] sm:$0xff]   ;;  %v3275_v7 = vld [vmem:[#allocation5 + $0xe8] sm:$0xff]  }
  0xf6   :  { %v3709_v17 = vpop.f32.mrf.mxu1 }
  0xf7   :  { %v286_v3 = vmax.f32 %v232_v62, 0.0  ;;  %v224_v4 = vadd.f32 %v2622_v32, %v3709_v17  ;;  %v3242_v17 = vld [vmem:[#allocation2 + $0x28] sm:$0xff]  }
  0xf8   :  { %v3087_v20 = vpop.f32.mrf.mxu1 }
  0xf9   :  { %v245_v55 = vadd.f32 %v3087_v20, %v2622_v32  ;;  %v336_v8 = vpack.c.bf16 %v286_v3, %v285_v6  ;;  %v284_v9 = vmax.f32 %v224_v4, 0.0  ;;  %v3246_v20 = vld [vmem:[#allocation2 + $0x48] sm:$0xff]  }
  0xfa   :  { %v236_v21 = vpop.f32.mrf.mxu1 }
  0xfb   :  { %v289_v60 = vmax.f32 %v245_v55, 0.0  ;;  %v237_v61 = vadd.f32 %v2622_v32, %v236_v21  ;;  %v335_v13 = vpack.c.bf16 %v284_v9, %v283_v10  ;;  %v3247_v21 = vld [vmem:[#allocation2 + $0x50] sm:$0xff]   ;;  %v3276_v9 = vld [vmem:[#allocation5 + $0xa8] sm:$0xff]  }
  0xfc   :  { %v3088_v24 = vpop.f32.mrf.mxu1 }
  0xfd   :  { %v248_v52 = vadd.f32 %v3088_v24, %v2622_v32  ;;  %v287_v2 = vmax.f32 %v237_v61, 0.0  ;;  %v3250_v24 = vld [vmem:[#allocation2 + $0x68] sm:$0xff]  }
  0xfe   :  { %v239_v25 = vpop.f32.mrf.mxu1 }
  0xff   :  { %v290_v57 = vmax.f32 %v248_v52, 0.0  ;;  %v240_v58 = vadd.f32 %v2622_v32, %v239_v25  ;;  %v3251_v25 = vld [vmem:[#allocation2 + $0x70] sm:$0xff]  }
 0x100   :  { %v3091_v27 = vpop.f32.mrf.mxu1  ;;  %v3311_v52 = vld [vmem:[#allocation5 + $0x1c0] sm:$0xff]  }
 0x101   :  { %v261_v43 = vadd.f32 %v3091_v27, %v2622_v32  ;;  %v338_v63 = vpack.c.bf16 %v290_v57, %v289_v60  ;;  %v288_v0 = vmax.f32 %v240_v58, 0.0  ;;  %v3253_v27 = vld [vmem:[#allocation2 + $0x80] sm:$0xff]  }
 0x102   :  { %v252_v28 = vpop.f32.mrf.mxu1 }
 0x103   :  { %v293_v50 = vmax.f32 %v261_v43, 0.0  ;;  %v253_v51 = vadd.f32 %v2622_v32, %v252_v28  ;;  %v337_v5 = vpack.c.bf16 %v288_v0, %v287_v2  ;;  %v3254_v28 = vld [vmem:[#allocation2 + $0x88] sm:$0xff]   ;;  %v3292_v43 = vld [vmem:[#allocation5 + $0x1a8] sm:$0xff]   ;;  %v3273_v2 = vld [vmem:[#allocation5 + $0xf0] sm:$0xff]  }
 0x104   :  { %v3092_v29 = vpop.f32.mrf.mxu1 }
 0x105   :  { %v264_v39 = vadd.f32 %v3092_v29, %v2622_v32  ;;  %v291_v56 = vmax.f32 %v253_v51, 0.0  ;;  %v3263_v29 = vld [vmem:[#allocation5 + $0x58] sm:$0xff]   ;;  %v3308_v51 = vld [vmem:[#allocation5 + $0x188] sm:$0xff]  }
 0x106   :  { %v255_v30 = vpop.f32.mrf.mxu1  ;;  %2859 = vmatprep.subr.bf16.mxu0 %v3263_v29  ;;  %v3289_v29 = vld [vmem:[#allocation5 + $0xc0] sm:$0xff]  }
 0x107   :  { %v294_v47 = vmax.f32 %v264_v39, 0.0  ;;  %v256_v48 = vadd.f32 %v2622_v32, %v255_v30  ;;  %v3264_v30 = vld [vmem:[#allocation5 + $0x18] sm:$0xff]  }
 0x108   :  { %v3095_v31 = vpop.f32.mrf.mxu1  ;;  %2860 = vmatpush3.bf16.msra.mxu0 %v3264_v30  ;;  %v3278_v39 = vld [vmem:[#allocation5 + $0x1b8] sm:$0xff]  }
 0x109   :  { %v277_v34 = vadd.f32 %v3095_v31, %v2622_v32  ;;  %v340_v53 = vpack.c.bf16 %v294_v47, %v293_v50  ;;  %v292_v54 = vmax.f32 %v256_v48, 0.0  ;;  %v3265_v31 = vld [vmem:[#allocation5 + $0x50] sm:$0xff]   ;;  %v3300_v47 = vld [vmem:[#allocation5 + $0x198] sm:$0xff]   ;;  %v3307_v50 = vld [vmem:[#allocation5 + $0x1c8] sm:$0xff]  }
 0x10a   :  { %v268_v33 = vpop.f32.mrf.mxu1  ;;  %2861 = vmatprep.subr.bf16.mxu0 %v3265_v31  ;;  %v3303_v48 = vld [vmem:[#allocation5 + $0x1d0] sm:$0xff]   ;;  %v3291_v31 = vld [vmem:[#allocation5 + $0x80] sm:$0xff]  }
 0x10b   :  { %v269_v36 = vadd.f32 %v2622_v32, %v268_v33  ;;  %v297_v40 = vmax.f32 %v277_v34, 0.0  ;;  %v339_v59 = vpack.c.bf16 %v292_v54, %v291_v56  ;;  %v3267_v33 = vld [vmem:[#allocation5 + $0x48] sm:$0xff]  }
 0x10c   :  { %v3096_v35 = vpop.f32.mrf.mxu1  ;;  %v3268_v34 = vld [vmem:[#allocation5 + $0x8] sm:$0xff]  }
 0x10d   :  { %v280_v37 = vadd.f32 %v3096_v35, %v2622_v32  ;;  %v295_v44 = vmax.f32 %v269_v36, 0.0  ;;  %v3269_v35 = vld [vmem:[#allocation5 + $0x40] sm:$0xff]  }
 0x10e   :  { %v271_v38 = vpop.f32.mrf.mxu1  ;;  %v3270_v36 = vld [vmem:[#allocation5] sm:$0xff]  }
 0x10f   :  { %v298_v41 = vmax.f32 %v280_v37, 0.0  ;;  %v272_v42 = vadd.f32 %v2622_v32, %v271_v38  ;;  %v3266_v32 = vld [vmem:[#allocation5 + $0x10] sm:$0xff]   ;;  %v3271_v37 = vld [vmem:[#allocation5 + $0xf8] sm:$0xff]  }
 0x110   :  { %2862 = vmatpush3.bf16.msra.mxu0 %v3266_v32  ;;  %v3277_v38 = vld [vmem:[#allocation5 + $0x1f8] sm:$0xff]  }
 0x111   :  { %v342_v45 = vpack.c.bf16 %v298_v41, %v297_v40  ;;  %v296_v46 = vmax.f32 %v272_v42, 0.0  ;;  %2863 = vmatprep.subr.bf16.mxu0 %v3267_v33  ;;  %v3283_v40 = vld [vmem:[#allocation5 + $0x1f0] sm:$0xff]   ;;  %v3290_v42 = vld [vmem:[#allocation5 + $0x1e8] sm:$0xff]   ;;  %v3293_v33 = vld [vmem:[#allocation5 + $0x178] sm:$0xff]  }
 0x112   :  { %v3285_v41 = vld [vmem:[#allocation5 + $0x1b0] sm:$0xff]  }
 0x113   :  { %v341_v49 = vpack.c.bf16 %v296_v46, %v295_v44  ;;  %3097 = vmatprep.subr.bf16.mxu1 %v342_v45  ;;  %v3295_v44 = vld [vmem:[#allocation5 + $0x1e0] sm:$0xff]   ;;  %v3299_v46 = vld [vmem:[#allocation5 + $0x1d8] sm:$0xff]  }
 0x114   :  { %3098 = vmatpush3.bf16.msra.mxu1 %v342_v45  ;;  %2864 = vmatpush3.bf16.msra.mxu0 %v3268_v34  ;;  %v3296_v45 = vld [vmem:[#allocation5 + $0x1a0] sm:$0xff]  }
 0x115   :  { %3099 = vmatprep.subr.bf16.mxu1 %v341_v49  ;;  %2865 = vmatprep.subr.bf16.mxu0 %v3269_v35  ;;  %v3294_v35 = vld [vmem:[#allocation5 + $0x138] sm:$0xff]  }
 0x118   :  { %3100 = vmatpush3.bf16.msra.mxu1 %v341_v49  ;;  %2866 = vmatpush3.bf16.msra.mxu0 %v3270_v36  ;;  %v3304_v49 = vld [vmem:[#allocation5 + $0x190] sm:$0xff]  }
 0x119   :  { %3101 = vmatprep.subr.bf16.mxu1 %v340_v53  ;;  %2879 = vmatprep.subr.bf16.mxu0 %v3271_v37 }
 0x11c   :  { %3102 = vmatpush3.bf16.msra.mxu1 %v340_v53  ;;  %v3312_v53 = vld [vmem:[#allocation5 + $0x180] sm:$0xff]  }
 0x11d   :  { %3103 = vmatprep.subr.bf16.mxu1 %v339_v59 }
 0x120   :  { %3104 = vmatpush3.bf16.msra.mxu1 %v339_v59 }
 0x121   :  { %3105 = vmatprep.subr.bf16.mxu1 %v338_v63 }
 0x124   :  { %3106 = vmatpush3.bf16.msra.mxu1 %v338_v63  ;;  %v3272_v63 = vld [vmem:[#allocation5 + $0xb8] sm:$0xff]  }
 0x125   :  { %3107 = vmatprep.subr.bf16.mxu1 %v337_v5 }
 0x128   :  { %3108 = vmatpush3.bf16.msra.mxu1 %v337_v5  ;;  %v3274_v5 = vld [vmem:[#allocation5 + $0xb0] sm:$0xff]  }
 0x129   :  { %3109 = vmatprep.subr.bf16.mxu1 %v336_v8 }
 0x12c   :  { %3110 = vmatpush3.bf16.msra.mxu1 %v336_v8 }
 0x12d   :  { %3111 = vmatprep.subr.bf16.mxu1 %v335_v13 }
 0x130   :  { %3112 = vmatpush3.bf16.msra.mxu1 %v335_v13 }
 0x131   :  { %2935 = vmatprep.subr.bf16.mxu1 %v3277_v38  ;;  %v3297_v38 = vld [vmem:[#allocation5 + $0x170] sm:$0xff]  }
 0x133   :  { %3114 = vmatmul.mubr.bf16.vlgmr.msra.gmra.mxu1 %v3238_v11  ;;  %v3279_v11 = vld [vmem:[#allocation5 + $0xe0] sm:$0xff]  }
 0x134   :  { %3117 = vmatprep.mubr.bf16.mxu1 %v3239_v14  ;;  %2936 = vmatpush3.bf16.msra.mxu1 %v3278_v39 }
 0x135   :  { %2937 = vmatprep.subr.bf16.mxu1 %v3283_v40 }
 0x138   :  { %2938 = vmatpush3.bf16.msra.mxu1 %v3285_v41  ;;  %v3298_v41 = vld [vmem:[#allocation5 + $0x130] sm:$0xff]  }
 0x139   :  { %2939 = vmatprep.subr.bf16.mxu1 %v3290_v42 }
 0x13b   :  { %3118 = vmatmul.mubr.bf16.gmra.mxu1 %v3240_v15  ;;  %v3280_v15 = vld [vmem:[#allocation5 + $0xa0] sm:$0xff]  }
 0x13c   :  { %3121 = vmatprep.mubr.bf16.mxu1 %v3241_v16  ;;  %2940 = vmatpush3.bf16.msra.mxu1 %v3292_v43  ;;  %v3301_v43 = vld [vmem:[#allocation5 + $0x168] sm:$0xff]  }
 0x13d   :  { %2941 = vmatprep.subr.bf16.mxu1 %v3295_v44 }
 0x140   :  { %2942 = vmatpush3.bf16.msra.mxu1 %v3296_v45 }
 0x141   :  { %2943 = vmatprep.subr.bf16.mxu1 %v3299_v46  ;;  %v3302_v46 = vld [vmem:[#allocation5 + $0x128] sm:$0xff]  }
 0x143   :  { %3122 = vmatmul.mubr.bf16.gmra.mxu1 %v3242_v17  ;;  %v3281_v17 = vld [vmem:[#allocation5 + $0xd8] sm:$0xff]  }
 0x144   :  { %3125 = vmatprep.mubr.bf16.mxu1 %v3243_v12  ;;  %2944 = vmatpush3.bf16.msra.mxu1 %v3300_v47 }
 0x145   :  { %2945 = vmatprep.subr.bf16.mxu1 %v3303_v48 }
 0x148   :  { %2946 = vmatpush3.bf16.msra.mxu1 %v3304_v49  ;;  %v3305_v49 = vld [vmem:[#allocation5 + $0x160] sm:$0xff]  }
 0x149   :  { %2947 = vmatprep.subr.bf16.mxu1 %v3307_v50 }
 0x14b   :  { %3126 = vmatmul.mubr.bf16.gmra.mxu1 %v3244_v18 }
 0x14c   :  { %3129 = vmatprep.mubr.bf16.mxu1 %v3245_v19  ;;  %2948 = vmatpush3.bf16.msra.mxu1 %v3308_v51  ;;  %v3282_v19 = vld [vmem:[#allocation5 + $0x98] sm:$0xff]   ;;  %v3306_v51 = vld [vmem:[#allocation5 + $0x120] sm:$0xff]  }
 0x14d   :  { %2949 = vmatprep.subr.bf16.mxu1 %v3311_v52 }
 0x150   :  { %2950 = vmatpush3.bf16.msra.mxu1 %v3312_v53  ;;  %v3309_v53 = vld [vmem:[#allocation5 + $0x158] sm:$0xff]  }
 0x153   :  { %3130 = vmatmul.mubr.bf16.gmra.mxu1 %v3246_v20 }
 0x154   :  { %3133 = vmatprep.mubr.bf16.mxu1 %v3247_v21  ;;  %v3284_v21 = vld [vmem:[#allocation5 + $0xd0] sm:$0xff]  }
 0x15b   :  { %3134 = vmatmul.mubr.bf16.gmra.mxu1 %v3248_v22 }
 0x15c   :  { %3137 = vmatprep.mubr.bf16.mxu1 %v3249_v23  ;;  %v3286_v23 = vld [vmem:[#allocation5 + $0x90] sm:$0xff]  }
 0x163   :  { %3138 = vmatmul.mubr.bf16.gmra.mxu1 %v3250_v24 }
 0x164   :  { %3141 = vmatprep.mubr.bf16.mxu1 %v3251_v25  ;;  %v3287_v25 = vld [vmem:[#allocation5 + $0xc8] sm:$0xff]  }
 0x16b   :  { %3142 = vmatmul.mubr.bf16.gmra.mxu1 %v3252_v26 }
 0x16c   :  { %3145 = vmatprep.mubr.bf16.mxu1 %v3253_v27  ;;  %v3288_v27 = vld [vmem:[#allocation5 + $0x88] sm:$0xff]  }
 0x173   :  { %3146 = vmatmul.mubr.bf16.gmra.mxu1 %v3254_v28 }
 0x1f3   :  { %v3115_v54 = vpop.f32.mrf.mxu1 }
 0x1f5   :  { %v485_v55 = vpop.f32.mrf.mxu1 }
 0x1f7   :  { %v3116_v56 = vpop.f32.mrf.mxu1 }
 0x1f8   :  { %v637_v10 = vpack.c.bf16 %v3116_v56, %v3115_v54 }
 0x1f9   :  { %v488_v57 = vpop.f32.mrf.mxu1 }
 0x1fa   :  { %v628_v0 = vpack.c.bf16 %v488_v57, %v485_v55 }
 0x1fb   :  { %v3119_v58 = vpop.f32.mrf.mxu1 }
 0x1fd   :  { %v501_v59 = vpop.f32.mrf.mxu1 }
 0x1ff   :  { %v3120_v60 = vpop.f32.mrf.mxu1 }
 0x200   :  { %v638_v3 = vpack.c.bf16 %v3120_v60, %v3119_v58  ;;  %v3310_v58 = vld [vmem:[#allocation5 + $0x118] sm:$0xff]   ;;  %v3314_v60 = vld [vmem:[#allocation5 + $0x110] sm:$0xff]  }
 0x201   :  { %v504_v61 = vpop.f32.mrf.mxu1 }
 0x202   :  { %v629_v62 = vpack.c.bf16 %v504_v61, %v501_v59  ;;  %v3313_v59 = vld [vmem:[#allocation5 + $0x150] sm:$0xff]   ;;  %v3315_v61 = vld [vmem:[#allocation5 + $0x148] sm:$0xff]  }
 0x203   :  { %v3717_v1 = vpop.f32.mrf.mxu1 }
 0x204   :  { %1261 = vmatprep.mubr.bf16.mxu0 %v629_v62 }
 0x205   :  { %1262 = vmatmul.mubr.bf16.vlgmr.msra.gmra.mxu0 %v628_v0  ;;  %v517_v4 = vpop.f32.mrf.mxu1  ;;  %v3317_v0 = vld [vmem:[#allocation5 + $0x140] sm:$0xff]  }
 0x206   :  { %2880 = vmatpush3.bf16.msra.mxu0 %v3272_v63  ;;  %1269 = vmatprep.mubr.bf16.mxu0 %v638_v3  ;;  %v3316_v63 = vld [vmem:[#allocation5 + $0x108] sm:$0xff]   ;;  %v3319_v3 = vld [vmem:[#allocation5 + $0x238] sm:$0xff]  }
 0x207   :  { %2881 = vmatprep.subr.bf16.mxu0 %v3273_v2  ;;  %v3719_v6 = vpop.f32.mrf.mxu1  ;;  %v3318_v2 = vld [vmem:[#allocation5 + $0x100] sm:$0xff]  }
 0x208   :  { %v639_v47 = vpack.c.bf16 %v3719_v6, %v3717_v1  ;;  %v3320_v6 = vld [vmem:[#allocation5 + $0x230] sm:$0xff]  }
 0x209   :  { %v520_v8 = vpop.f32.mrf.mxu1 }
 0x20a   :  { %2882 = vmatpush3.bf16.msra.mxu0 %v3274_v5  ;;  %v630_v36 = vpack.c.bf16 %v520_v8, %v517_v4 }
 0x20b   :  { %2883 = vmatprep.subr.bf16.mxu0 %v3275_v7  ;;  %v3127_v13 = vpop.f32.mrf.mxu1 }
 0x20d   :  { %1270 = vmatmul.mubr.bf16.gmra.mxu0 %v637_v10  ;;  %v533_v14 = vpop.f32.mrf.mxu1 }
 0x20e   :  { %2884 = vmatpush3.bf16.msra.mxu0 %v3276_v9  ;;  %v3321_v9 = vld [vmem:[#allocation5 + $0x228] sm:$0xff]  }
 0x20f   :  { %2885 = vmatprep.subr.bf16.mxu0 %v3279_v11  ;;  %v3128_v16 = vpop.f32.mrf.mxu1 }
 0x210   :  { %v640_v39 = vpack.c.bf16 %v3128_v16, %v3127_v13  ;;  %v3324_v16 = vld [vmem:[#allocation5 + $0x210] sm:$0xff]  }
 0x211   :  { %v536_v12 = vpop.f32.mrf.mxu1 }
 0x212   :  { %2886 = vmatpush3.bf16.msra.mxu0 %v3280_v15  ;;  %v631_v18 = vpack.c.bf16 %v536_v12, %v533_v14  ;;  %v3322_v14 = vld [vmem:[#allocation5 + $0x220] sm:$0xff]   ;;  %v3323_v15 = vld [vmem:[#allocation5 + $0x218] sm:$0xff]  }
 0x213   :  { %2887 = vmatprep.subr.bf16.mxu0 %v3281_v17  ;;  %v3721_v20 = vpop.f32.mrf.mxu1  ;;  %v3325_v17 = vld [vmem:[#allocation5 + $0x208] sm:$0xff]   ;;  %v3326_v12 = vld [vmem:[#allocation5 + $0x200] sm:$0xff]  }
 0x214   :  { %1310 = vmatprep.mubr.bf16.mxu0 %v631_v18 }
 0x215   :  { %v3723_v22 = vpop.f32.mrf.mxu1 }
 0x216   :  { %2888 = vmatpush3.bf16.msra.mxu0 %v3282_v19  ;;  %v3579_v19 = vmov 0.0  }
 0x217   :  { %2889 = vmatprep.subr.bf16.mxu0 %v3284_v21  ;;  %v3725_v24 = vpop.f32.mrf.mxu1 }
 0x218   :  { %v641_v11 = vpack.c.bf16 %v3725_v24, %v3721_v20  ;;  %v3332_v24 = vld [vmem:[#allocation7 + $0x78] sm:$0xff]  }
 0x219   :  { %v3727_v26 = vpop.f32.mrf.mxu1  ;;  %2980 = vmatprep.subr.bf16.mxu1 %v3332_v24 }
 0x21a   :  { %2890 = vmatpush3.bf16.msra.mxu0 %v3286_v23  ;;  %v632_v5 = vpack.c.bf16 %v3727_v26, %v3723_v22  ;;  %v3334_v26 = vld [vmem:[#allocation7 + $0x70] sm:$0xff]  }
 0x21b   :  { %2891 = vmatprep.subr.bf16.mxu0 %v3287_v25  ;;  %v3729_v28 = vpop.f32.mrf.mxu1  ;;  %v3333_v25 = vld [vmem:[#allocation7 + $0x38] sm:$0xff]  }
 0x21d   :  { %v565_v30 = vpop.f32.mrf.mxu1 }
 0x21e   :  { %2892 = vmatpush3.bf16.msra.mxu0 %v3288_v27 }
 0x21f   :  { %2893 = vmatprep.subr.bf16.mxu0 %v3289_v29  ;;  %v3731_v32 = vpop.f32.mrf.mxu1  ;;  %v3336_v29 = vld [vmem:[#allocation7 + $0x68] sm:$0xff]  }
 0x220   :  { %v642_v8 = vpack.c.bf16 %v3731_v32, %v3729_v28  ;;  %v3335_v28 = vld [vmem:[#allocation7 + $0x30] sm:$0xff]   ;;  %v3340_v32 = vld [vmem:[#allocation7 + $0x60] sm:$0xff]  }
 0x221   :  { %v568_v34 = vpop.f32.mrf.mxu1 }
 0x222   :  { %2894 = vmatpush3.bf16.msra.mxu0 %v3291_v31  ;;  %v633_v45 = vpack.c.bf16 %v568_v34, %v565_v30  ;;  %v3338_v31 = vld [vmem:[#allocation7 + $0x28] sm:$0xff]   ;;  %v3342_v34 = vld [vmem:[#allocation7 + $0x20] sm:$0xff]  }
 0x223   :  { %2907 = vmatprep.subr.bf16.mxu0 %v3293_v33  ;;  %v3139_v37 = vpop.f32.mrf.mxu1 }
 0x225   :  { %1311 = vmatmul.mubr.bf16.vlgmr.msra.gmra.mxu0 %v630_v36  ;;  %v581_v40 = vpop.f32.mrf.mxu1 }
 0x226   :  { %1318 = vmatprep.mubr.bf16.mxu0 %v640_v39  ;;  %2908 = vmatpush3.bf16.msra.mxu0 %v3294_v35  ;;  %v3344_v35 = vld [vmem:[#allocation7 + $0x58] sm:$0xff]   ;;  %v3348_v39 = vld [vmem:[#allocation7 + $0x50] sm:$0xff]  }
 0x227   :  { %2909 = vmatprep.subr.bf16.mxu0 %v3297_v38  ;;  %v3140_v42 = vpop.f32.mrf.mxu1 }
 0x228   :  { %v643_v62 = vpack.c.bf16 %v3140_v42, %v3139_v37  ;;  %v3346_v37 = vld [vmem:[#allocation7 + $0x18] sm:$0xff]   ;;  %v3352_v42 = vld [vmem:[#allocation7 + $0x48] sm:$0xff]  }
 0x229   :  { %v584_v44 = vpop.f32.mrf.mxu1 }
 0x22a   :  { %2910 = vmatpush3.bf16.msra.mxu0 %v3298_v41  ;;  %v634_v54 = vpack.c.bf16 %v584_v44, %v581_v40  ;;  %v3350_v40 = vld [vmem:[#allocation7 + $0x10] sm:$0xff]  }
 0x22b   :  { %2911 = vmatprep.subr.bf16.mxu0 %v3301_v43  ;;  %v3143_v48 = vpop.f32.mrf.mxu1 }
 0x22d   :  { %1319 = vmatmul.mubr.bf16.gmra.mxu0 %v639_v47  ;;  %v597_v50 = vpop.f32.mrf.mxu1 }
 0x22e   :  { %2912 = vmatpush3.bf16.msra.mxu0 %v3302_v46  ;;  %1359 = vmatprep.mubr.bf16.mxu0 %v633_v45 }
 0x22f   :  { %2913 = vmatprep.subr.bf16.mxu0 %v3305_v49  ;;  %v3144_v52 = vpop.f32.mrf.mxu1 }
 0x230   :  { %v644_v56 = vpack.c.bf16 %v3144_v52, %v3143_v48 }
 0x231   :  { %v600_v55 = vpop.f32.mrf.mxu1 }
 0x232   :  { %2914 = vmatpush3.bf16.msra.mxu0 %v3306_v51  ;;  %v635_v57 = vpack.c.bf16 %v600_v55, %v597_v50 }
 0x233   :  { %2915 = vmatprep.subr.bf16.mxu0 %v3309_v53  ;;  %v3147_v1 = vpop.f32.mrf.mxu1 }
 0x234   :  { %1408 = vmatprep.mubr.bf16.mxu1 %v635_v57 }
 0x235   :  { %1409 = vmatmul.mubr.bf16.vlgmr.msra.gmra.mxu1 %v634_v54  ;;  %v613_v4 = vpop.f32.mrf.mxu1 }
 0x236   :  { %2916 = vmatpush3.bf16.msra.mxu0 %v3310_v58  ;;  %1416 = vmatprep.mubr.bf16.mxu1 %v644_v56 }
 0x237   :  { %2917 = vmatprep.subr.bf16.mxu0 %v3313_v59  ;;  %v3148_v7 = vpop.f32.mrf.mxu1  ;;  %2981 = vmatpush3.bf16.msra.mxu1 %v3333_v25 }
 0x238   :  { %v645_v18 = vpack.c.bf16 %v3148_v7, %v3147_v1  ;;  %2982 = vmatprep.subr.bf16.mxu1 %v3334_v26 }
 0x239   :  { %v616_v10 = vpop.f32.mrf.mxu1 }
 0x23a   :  { %2918 = vmatpush3.bf16.msra.mxu0 %v3314_v60  ;;  %v636_v13 = vpack.c.bf16 %v616_v10, %v613_v4 }
 0x23b   :  { %2919 = vmatprep.subr.bf16.mxu0 %v3315_v61  ;;  %2983 = vmatpush3.bf16.msra.mxu1 %v3335_v28 }
 0x23c   :  { %2984 = vmatprep.subr.bf16.mxu1 %v3336_v29 }
 0x23d   :  { %1417 = vmatmul.mubr.bf16.gmra.mxu1 %v643_v62 }
 0x23e   :  { %2920 = vmatpush3.bf16.msra.mxu0 %v3316_v63 }
 0x23f   :  { %2921 = vmatprep.subr.bf16.mxu0 %v3317_v0  ;;  %2985 = vmatpush3.bf16.msra.mxu1 %v3338_v31  ;;  %v2659_v0 = vld [vmem:[%s3891_s5] ss:$0 sm:$0xff] }
 0x240   :  { %2986 = vmatprep.subr.bf16.mxu1 %v3340_v32 }
 0x242   :  { %2922 = vmatpush3.bf16.msra.mxu0 %v3318_v2 }
 0x243   :  { %3149 = vmatprep.subr.bf16.mxu0 %v3319_v3  ;;  %2987 = vmatpush3.bf16.msra.mxu1 %v3342_v34 }
 0x244   :  { %2988 = vmatprep.subr.bf16.mxu1 %v3344_v35 }
 0x245   :  { %1360 = vmatmul.mubr.bf16.vlgmr.msra.gmra.mxu0 %v632_v5 }
 0x246   :  { %1367 = vmatprep.mubr.bf16.mxu0 %v642_v8  ;;  %3150 = vmatpush3.bf16.msra.mxu0 %v3319_v3 }
 0x247   :  { %3151 = vmatprep.subr.bf16.mxu0 %v3320_v6  ;;  %2989 = vmatpush3.bf16.msra.mxu1 %v3346_v37 }
 0x248   :  { %2990 = vmatprep.subr.bf16.mxu1 %v3348_v39 }
 0x24a   :  { %3152 = vmatpush3.bf16.msra.mxu0 %v3320_v6 }
 0x24b   :  { %3153 = vmatprep.subr.bf16.mxu0 %v3321_v9  ;;  %2991 = vmatpush3.bf16.msra.mxu1 %v3350_v40 }
 0x24c   :  { %2992 = vmatprep.subr.bf16.mxu1 %v3352_v42 }
 0x24d   :  { %1368 = vmatmul.mubr.bf16.gmra.mxu0 %v641_v11 }
 0x24e   :  { %3154 = vmatpush3.bf16.msra.mxu0 %v3321_v9  ;;  %3165 = vmatprep.mubr.bf16.mxu0 %v636_v13 }
 0x24f   :  { %3155 = vmatprep.subr.bf16.mxu0 %v3322_v14 }
 0x252   :  { %3156 = vmatpush3.bf16.msra.mxu0 %v3322_v14 }
 0x253   :  { %3157 = vmatprep.subr.bf16.mxu0 %v3323_v15 }
 0x256   :  { %3158 = vmatpush3.bf16.msra.mxu0 %v3323_v15 }
 0x257   :  { %3159 = vmatprep.subr.bf16.mxu0 %v3324_v16 }
 0x25a   :  { %3160 = vmatpush3.bf16.msra.mxu0 %v3324_v16 }
 0x25b   :  { %3161 = vmatprep.subr.bf16.mxu0 %v3325_v17 }
 0x25e   :  { %3162 = vmatpush3.bf16.msra.mxu0 %v3325_v17 }
 0x25f   :  { %3163 = vmatprep.subr.bf16.mxu0 %v3326_v12 }
 0x262   :  { %3164 = vmatpush3.bf16.msra.mxu0 %v3326_v12 }
 0x263   :  { %3169 = vmatprep.subr.bf16.mxu0 %v3579_v19 }
 0x265   :  { %3166 = vmatmul.mubr.bf16.vlgmr.msra.gmra.mxu0 %v645_v18 }
 0x266   :  { %3173 = vmatprep.mubr.msk.bf16.mxu0 %vm3580_vm1, %v3579_v19 }
 0x2c5   :  { %v2867_v20 = vpop.f32.mrf.mxu0 }
 0x2c7   :  { %v2868_v21 = vpop.f32.mrf.mxu0 }
 0x2c8   :  { %v2869_v62 = vadd.f32 %v2868_v21, %v2867_v20 }
 0x2c9   :  { %v2870_v22 = vpop.f32.mrf.mxu0 }
 0x2ca   :  { %v1264_v9 = vadd.f32 %v2869_v62, %v2659_v0 }
 0x2cb   :  { %v2871_v23 = vpop.f32.mrf.mxu0 }
 0x2cc   :  { %v2872_v6 = vadd.f32 %v2871_v23, %v2870_v22 }
 0x2cd   :  { %v2873_v27 = vpop.f32.mrf.mxu0 }
 0x2ce   :  { %v1267_v18 = vadd.f32 %v2872_v6, %v2659_v0 }
 0x2cf   :  { %v2874_v30 = vpop.f32.mrf.mxu0 }
 0x2d0   :  { %v2875_v60 = vadd.f32 %v2874_v30, %v2873_v27 }
 0x2d1   :  { %v2876_v33 = vpop.f32.mrf.mxu0 }
 0x2d2   :  { %v1272_v3 = vadd.f32 %v2875_v60, %v2659_v0 }
 0x2d3   :  { %v2877_v36 = vpop.f32.mrf.mxu0 }
 0x2d4   :  { %v2878_v1 = vadd.f32 %v2877_v36, %v2876_v33 }
 0x2d6   :  { %v1275_v11 = vadd.f32 %v2878_v1, %v2659_v0 }
 0x2e5   :  { %v2895_v38 = vpop.f32.mrf.mxu0 }
 0x2e7   :  { %v2896_v41 = vpop.f32.mrf.mxu0 }
 0x2e8   :  { %v2897_v4 = vadd.f32 %v2896_v41, %v2895_v38 }
 0x2e9   :  { %v2898_v43 = vpop.f32.mrf.mxu0 }
 0x2ea   :  { %v1313_v15 = vadd.f32 %v2897_v4, %v1264_v9 }
 0x2eb   :  { %v2899_v44 = vpop.f32.mrf.mxu0 }
 0x2ec   :  { %v2900_v16 = vadd.f32 %v2899_v44, %v2898_v43 }
 0x2ed   :  { %v2901_v45 = vpop.f32.mrf.mxu0 }
 0x2ee   :  { %v1316_v28 = vadd.f32 %v2900_v16, %v1267_v18 }
 0x2ef   :  { %v2902_v46 = vpop.f32.mrf.mxu0 }
 0x2f0   :  { %v2903_v63 = vadd.f32 %v2902_v46, %v2901_v45 }
 0x2f1   :  { %v2904_v47 = vpop.f32.mrf.mxu0 }
 0x2f2   :  { %v1321_v10 = vadd.f32 %v2903_v63, %v1272_v3 }
 0x2f3   :  { %v2905_v48 = vpop.f32.mrf.mxu0 }
 0x2f4   :  { %v2906_v7 = vadd.f32 %v2905_v48, %v2904_v47 }
 0x2f5   :  { %v2951_v50 = vpop.f32.mrf.mxu1 }
 0x2f6   :  { %v1324_v20 = vadd.f32 %v2906_v7, %v1275_v11  ;;  %v3339_v7 = vld [vmem:[#allocation7 + $0xb8] sm:$0xff]  }
 0x2f7   :  { %v2952_v53 = vpop.f32.mrf.mxu1 }
 0x2f8   :  { %v2953_v21 = vadd.f32 %v2952_v53, %v2951_v50 }
 0x2f9   :  { %v2954_v55 = vpop.f32.mrf.mxu1 }
 0x2fb   :  { %v2955_v57 = vpop.f32.mrf.mxu1 }
 0x2fc   :  { %v2956_v35 = vadd.f32 %v2955_v57, %v2954_v55  ;;  %v3337_v57 = vld [vmem:[#allocation7 + $0xf8] sm:$0xff]  }
 0x2fd   :  { %v2957_v59 = vpop.f32.mrf.mxu1 }
 0x2ff   :  { %v2958_v2 = vpop.f32.mrf.mxu1 }
 0x300   :  { %v2959_v24 = vadd.f32 %v2958_v2, %v2957_v59  ;;  %v3327_v2 = vld [vmem:[%s3892_s6] sm:$0xff]  }
 0x301   :  { %v2960_v14 = vpop.f32.mrf.mxu1 }
 0x303   :  { %v2961_v27 = vpop.f32.mrf.mxu1 }
 0x304   :  { %v2962_v30 = vadd.f32 %v2961_v27, %v2960_v14  ;;  %v3343_v27 = vld [vmem:[#allocation7 + $0xb0] sm:$0xff]  }
 0x305   :  { %v2923_v49 = vpop.f32.mrf.mxu0 }
 0x307   :  { %v2924_v51 = vpop.f32.mrf.mxu0 }
 0x308   :  { %v2925_v13 = vadd.f32 %v2924_v51, %v2923_v49 }
 0x309   :  { %v2926_v52 = vpop.f32.mrf.mxu0 }
 0x30a   :  { %v1362_v25 = vadd.f32 %v2925_v13, %v1313_v15  ;;  %v3341_v13 = vld [vmem:[#allocation7 + $0xf0] sm:$0xff]  }
 0x30b   :  { %v2927_v54 = vpop.f32.mrf.mxu0 }
 0x30c   :  { %v2928_v26 = vadd.f32 %v2927_v54, %v2926_v52  ;;  %v1411_v33 = vadd.f32 %v2953_v21, %v1362_v25 }
 0x30d   :  { %v2929_v56 = vpop.f32.mrf.mxu0 }
 0x30e   :  { %v1365_v31 = vadd.f32 %v2928_v26, %v1316_v28 }
 0x30f   :  { %v2930_v58 = vpop.f32.mrf.mxu0 }
 0x310   :  { %v2931_v5 = vadd.f32 %v2930_v58, %v2929_v56  ;;  %v1414_v42 = vadd.f32 %v2956_v35, %v1365_v31 }
 0x311   :  { %v2932_v61 = vpop.f32.mrf.mxu0 }
 0x312   :  { %v1370_v17 = vadd.f32 %v2931_v5, %v1321_v10 }
 0x313   :  { %v2933_v8 = vpop.f32.mrf.mxu0 }
 0x314   :  { %v2934_v12 = vadd.f32 %v2933_v8, %v2932_v61  ;;  %v1419_v23 = vadd.f32 %v2959_v24, %v1370_v17 }
 0x316   :  { %v1373_v22 = vadd.f32 %v2934_v12, %v1324_v20 }
 0x318   :  { %v1422_v38 = vadd.f32 %v2962_v30, %v1373_v22  ;;  %v3345_v30 = vld [vmem:[#allocation7 + $0xe8] sm:$0xff]  }
 0x325   :  { %v3167_v29 = vpop.f32.mrf.mxu0 }
 0x326   :  { %v1468_v32 = vadd.f32 %v3167_v29, %v1419_v23 }
 0x327   :  { %v1459_v34 = vpop.f32.mrf.mxu0 }
 0x328   :  { %v3747_v36 = vmax.f32 %v1468_v32, 0.0  ;;  %v1460_v37 = vadd.f32 %v1459_v34, %v1411_v33 }
 0x329   :  { %v3168_v39 = vpop.f32.mrf.mxu0 }
 0x32a   :  { %1480 = vst [vmem:[#allocation8 + $0x10] sm:$0xff] %v3747_v36  ;;  %v3750_v40 = vmax.f32 %v1460_v37, 0.0  ;;  %v1471_v41 = vadd.f32 %v3168_v39, %v1422_v38  ;;  %v2418_v44 = vrot.slane %v3747_v36, 1  ;;  %v2500_v61 = vrot.slane %v3747_v36, 2 }
 0x32b   :  { %v1462_v43 = vpop.f32.mrf.mxu0  ;;  %v2421_v3 = vrot.slane %v3747_v36, 4  ;;  %v2503_v6 = vrot.slane %v3747_v36, 3  ;;  %v2424_v10 = vrot.slane %v3747_v36, 5  ;;  %v2508_v18 = vrot.slane %v3747_v36, 6 }
 0x32c   :  { %1478 = vst [vmem:[#allocation8] sm:$0xff] %v3750_v40  ;;  %v3754_v45 = vmax.f32 %v1471_v41, 0.0  ;;  %v1463_v46 = vadd.f32 %v1462_v43, %v1414_v42  ;;  %v2398_v47 = vrot.slane %v3750_v40, 1  ;;  %v2401_v51 = vrot.slane %v3750_v40, 4  ;;  %v3328_v41 = vld [vmem:[%s3892_s6 + $0x8] sm:$0xff]  }
 0x32d   :  { %v2420_v52 = vmax.f32 %v3747_v36, %v2418_v44  ;;  %v2470_v53 = vrot.slane %v3750_v40, 2  ;;  %v2404_v55 = vrot.slane %v3750_v40, 5  ;;  %v2473_v60 = vrot.slane %v3750_v40, 3 }
 0x32e   :  { %1481 = vst [vmem:[#allocation8 + $0x18] sm:$0xff] %v3754_v45  ;;  %v3758_v48 = vmax.f32 %v1463_v46, 0.0  ;;  %v1492_v49 = vpack.c.bf16 %v3754_v45, %v3747_v36  ;;  %v2400_v50 = vmax.f32 %v3750_v40, %v2398_v47  ;;  %v2428_v58 = vrot.slane %v3754_v45, 1  ;;  %v3347_v47 = vld [vmem:[#allocation7 + $0xa8] sm:$0xff]  }
 0x32f   :  { %v2502_v5 = vmax.f32 %v2420_v52, %v2500_v61  ;;  %v2423_v16 = vmax.f32 %v2420_v52, %v2421_v3  ;;  %v2431_v12 = vrot.slane %v3754_v45, 4  ;;  %v2478_v24 = vrot.slane %v3750_v40, 6  ;;  %v3351_v61 = vld [vmem:[#allocation7 + $0xa0] sm:$0xff]  }
 0x330   :  { %1479 = vst [vmem:[#allocation8 + $0x8] sm:$0xff] %v3758_v48  ;;  %3170 = vmatpush3.bf16.msra.mxu0 %v1492_v49  ;;  %v2403_v54 = vmax.f32 %v2400_v50, %v2401_v51  ;;  %v2408_v56 = vrot.slane %v3758_v48, 1  ;;  %v2472_v59 = vmax.f32 %v2400_v50, %v2470_v53  ;;  %v1491_v62 = vpack.c.bf16 %v3758_v48, %v3750_v40  ;;  %v3349_v50 = vld [vmem:[#allocation7 + $0xe0] sm:$0xff]  }
 0x331   :  { %3171 = vmatprep.subr.bf16.mxu0 %v3579_v19  ;;  %v2411_v1 = vrot.slane %v3758_v48, 4  ;;  %v2414_v9 = vrot.slane %v3758_v48, 5  ;;  %v2505_v15 = vmax.f32 %v2502_v5, %v2503_v6  ;;  %v2430_v20 = vmax.f32 %v3754_v45, %v2428_v58 }
 0x332   :  { %v2406_v63 = vmax.f32 %v2403_v54, %v2404_v55  ;;  %v2410_v0 = vmax.f32 %v3758_v48, %v2408_v56  ;;  %v2475_v4 = vmax.f32 %v2472_v59, %v2473_v60  ;;  %v2426_v26 = vmax.f32 %v2423_v16, %v2424_v10 }
 0x333   :  { %v2506_v25 = vmax.f32 %v2505_v15, %v2421_v3  ;;  %v2434_v28 = vrot.slane %v3754_v45, 5  ;;  %v2433_v29 = vmax.f32 %v2430_v20, %v2431_v12  ;;  %v2481_v33 = vrot.slane %v3750_v40, 7  ;;  %v3329_v3 = vld [vmem:[%s3892_s6 + $0x10] sm:$0xff]  }
 0x334   :  { %3172 = vmatpush3.bf16.msra.mxu0 %v1491_v62  ;;  %v2413_v8 = vmax.f32 %v2410_v0, %v2411_v1  ;;  %v2438_v11 = vrot.slane %v2406_v63, 1  ;;  %v2476_v14 = vmax.f32 %v2475_v4, %v2401_v51  ;;  %v2511_v37 = vrot.slane %v3747_v36, 7  ;;  %v3353_v62 = vld [vmem:[#allocation7 + $0xd8] sm:$0xff]  }
 0x335   :  { %3002 = vmatprep.subr.bf16.mxu0 %v3337_v57  ;;  %v2507_v34 = vmax.f32 %v2506_v25, %v2424_v10  ;;  %v2436_v38 = vmax.f32 %v2433_v29, %v2434_v28  ;;  %v2446_v39 = vrot.slane %v2426_v26, 4  ;;  %v2448_v46 = vrot.slane %v2426_v26, 5  ;;  %v3355_v25 = vld [vmem:[#allocation7 + $0x98] sm:$0xff]   ;;  %v3357_v26 = vld [vmem:[#allocation7 + $0xd0] sm:$0xff]   ;;  %v3362_v29 = vld [vmem:[#allocation7 + $0x88] sm:$0xff]  }
 0x336   :  { %v2416_v17 = vmax.f32 %v2413_v8, %v2414_v9  ;;  %v2477_v21 = vmax.f32 %v2476_v14, %v2404_v55  ;;  %v2456_v31 = vsel %vm2455_vm2, %v2406_v63, %v2438_v11  ;;  %v2486_v57 = vrot.slane %v3758_v48, 2 }
 0x337   :  { %3174 = vmatmul.mubr.msk.bf16.vlgmr.msra.gmra.mxu0 %vm161_vm0, %v3327_v2  ;;  %v2510_v44 = vmax.f32 %v2507_v34, %v2508_v18  ;;  %v2451_v49 = vrot.slane %v2436_v38, 2  ;;  %v2453_v52 = vrot.slane %v2436_v38, 3  ;;  %v2489_v0 = vrot.slane %v3758_v48, 3  ;;  %v3363_v38 = vld [vmem:[#allocation7 + $0x138] sm:$0xff]  }
 0x338   :  { %3177 = vmatprep.mubr.msk.bf16.mxu0 %vm3580_vm1, %v3579_v19  ;;  %3003 = vmatpush3.bf16.msra.mxu0 %v3339_v7  ;;  %v2441_v22 = vrot.slane %v2416_v17, 6  ;;  %v2443_v23 = vrot.slane %v2416_v17, 7  ;;  %v2480_v32 = vmax.f32 %v2477_v21, %v2478_v24  ;;  %v2519_v6 = vrot.slane %v3754_v45, 3  ;;  %v3331_v24 = vld [vmem:[%s3892_s6 + $0x20] ss:$0 sps:$4 sm:$0xff]  }
 0x339   :  { %3004 = vmatprep.subr.bf16.mxu0 %v3341_v13  ;;  %v2513_v51 = vmax.f32 %v2510_v44, %v2511_v37  ;;  %v2494_v10 = vrot.slane %v3758_v48, 6  ;;  %v2524_v15 = vrot.slane %v3754_v45, 6  ;;  %v2497_v16 = vrot.slane %v3758_v48, 7  ;;  %v3367_v44 = vld [vmem:[#allocation7 + $0x130] sm:$0xff]  }
 0x33a   :  { %v2458_v35 = vsel %vm2457_vm3, %v2456_v31, %v2441_v22  ;;  %v2483_v43 = vmax.f32 %v2480_v32, %v2481_v33  ;;  %v3360_v22 = vld [vmem:[#allocation7 + $0xc8] sm:$0xff]   ;;  %v3366_v31 = vld [vmem:[#allocation7 + $0x80] sm:$0xff]   ;;  %v3369_v32 = vld [vmem:[#allocation7 + $0x1f8] sm:$0xff]  }
 0x33b   :  { %v2460_v42 = vsel %vm2459_vm4, %v2458_v35, %v2443_v23  ;;  %v2514_v59 = vmax.f32 %v2513_v51, %v3754_v45  ;;  %v3361_v23 = vld [vmem:[#allocation7 + $0x178] sm:$0xff]  }
 0x33c   :  { %3005 = vmatpush3.bf16.msra.mxu0 %v3343_v27  ;;  %v2462_v40 = vsel %vm2461_vm5, %v2460_v42, %v2446_v39  ;;  %v2484_v36 = vmax.f32 %v2483_v43, %v3758_v48  ;;  %v3354_v48 = vld [vmem:[#allocation7 + $0x8] sm:$0xff]   ;;  %v3358_v27 = vld [vmem:[#allocation7] sm:$0xff]   ;;  %v3365_v42 = vld [vmem:[#allocation7 + $0x170] sm:$0xff]  }
 0x33d   :  { %3006 = vmatprep.subr.bf16.mxu0 %v3345_v30  ;;  %v2464_v53 = vsel %vm2463_vm6, %v2462_v40, %v2448_v46  ;;  %v2515_v2 = vmax.f32 %v2514_v59, %v2428_v58  ;;  %2993 = vmatpush3.bf16.msra.mxu1 %v3354_v48  ;;  %v3364_v30 = vld [vmem:[#allocation7 + $0xc0] sm:$0xff]   ;;  %v3371_v51 = vld [vmem:[#allocation7 + $0x1b8] sm:$0xff]   ;;  %v3375_v59 = vld [vmem:[#allocation7 + $0x1b0] sm:$0xff]  }
 0x33e   :  { %v2466_v54 = vsel %vm2465_vm7, %v2464_v53, %v2451_v49  ;;  %v2485_v55 = vmax.f32 %v2484_v36, %v2408_v56  ;;  %v2516_v56 = vrot.slane %v3754_v45, 2  ;;  %v3370_v36 = vld [vmem:[#allocation7 + $0x128] sm:$0xff]   ;;  %v3373_v53 = vld [vmem:[#allocation7 + $0x1f0] sm:$0xff]  }
 0x33f   :  { %3178 = vmatmul.mubr.msk.bf16.gmra.mxu0 %vm161_vm0, %v3328_v41  ;;  %v2468_v60 = vsel %vm2467_vm8, %v2466_v54, %v2453_v52  ;;  %v3372_v52 = vld [vmem:[#allocation7 + $0x160] sm:$0xff]  }
 0x340   :  { %3181 = vmatprep.mubr.msk.bf16.mxu0 %vm3580_vm1, %v3579_v19  ;;  %3007 = vmatpush3.bf16.msra.mxu0 %v3347_v47  ;;  %2469 = vst [vmem:[#allocation11] sm:$0xff] %v2468_v60  ;;  %v2488_v63 = vmax.f32 %v2485_v55, %v2486_v57  ;;  %v2518_v5 = vmax.f32 %v2515_v2, %v2516_v56  ;;  %v3368_v47 = vld [vmem:[#allocation7 + $0x168] sm:$0xff]   ;;  %v3374_v57 = vld [vmem:[#allocation7 + $0x120] sm:$0xff]   ;;  %v3376_v60 = vld [vmem:[#allocation7 + $0x158] sm:$0xff]  }
 0x341   :  { %3008 = vmatprep.subr.bf16.mxu0 %v3349_v50  ;;  %v3379_v2 = vld [vmem:[#allocation7 + $0x1a8] sm:$0xff]  }
 0x342   :  { %v2491_v4 = vmax.f32 %v2488_v63, %v2489_v0  ;;  %v2521_v8 = vmax.f32 %v2518_v5, %v2519_v6  ;;  %v3378_v0 = vld [vmem:[#allocation7 + $0x118] sm:$0xff]  }
 0x344   :  { %3009 = vmatpush3.bf16.msra.mxu0 %v3351_v61  ;;  %v2492_v7 = vmax.f32 %v2491_v4, %v2411_v1  ;;  %v2522_v13 = vmax.f32 %v2521_v8, %v2431_v12  ;;  %v3330_v1 = vld [vmem:[%s3892_s6 + $0x18] sm:$0xff]   ;;  %v3381_v4 = vld [vmem:[#allocation7 + $0x1e0] sm:$0xff]   ;;  %s3581_s6 = smov [#allocation12]  }
 0x345   :  { %3010 = vmatprep.subr.bf16.mxu0 %v3353_v62  ;;  %v3377_v61 = vld [vmem:[#allocation7 + $0x1e8] sm:$0xff]   ;;  %v3383_v8 = vld [vmem:[#allocation7 + $0x1a0] sm:$0xff]   ;;  %s2588_s1 = sshll.u32 %s3581_s6, 4  ;;  %s2589_s1 = int_to_ptr.vmem [resolvable:$true] %s2588_s1 }
 0x346   :  { %v2493_v58 = vmax.f32 %v2492_v7, %v2414_v9  ;;  %v2523_v14 = vmax.f32 %v2522_v13, %v2434_v28  ;;  %v2527_v9 = vrot.slane %v3754_v45, 7  ;;  %v3356_v45 = vld [vmem:[#allocation7 + $0x40] sm:$0xff]   ;;  %v3359_v28 = vld [vmem:[#allocation7 + $0x90] sm:$0xff]   ;;  %s3464_s15 = scalar_lea.vmem %s2589_s1, 32  ;;  %p3469_p2 = scmp.lt.s32.totalorder %s2589_s1, %s2589_s1 }
 0x347   :  { %3182 = vmatmul.mubr.msk.bf16.gmra.mxu0 %vm161_vm0, %v3329_v3  ;;  %2994 = vmatprep.subr.bf16.mxu1 %v3356_v45  ;;  %v3380_v3 = vld [vmem:[#allocation7 + $0x150] sm:$0xff]   ;;  %v3394_v45 = vld [vmem:[#allocation7 + $0x238] sm:$0xff]   ;;  %p3465_p1 = scmp.ne.s32.totalorder %s2589_s1, %s3464_s15  ;;  %p3470_p3 = scmp.lt.s32.totalorder %s3464_s15, %s3464_s15 }
 0x348   :  { %3185 = vmatprep.mubr.msk.bf16.mxu0 %vm3580_vm1, %v3579_v19  ;;  %v2496_v11 = vmax.f32 %v2493_v58, %v2494_v10  ;;  %v2526_v17 = vmax.f32 %v2523_v14, %v2524_v15  ;;  %3011 = vmatpush3.bf16.msra.mxu0 %v3355_v25  ;;  %v3382_v7 = vld [vmem:[#allocation7 + $0x110] sm:$0xff]   ;;  %v3384_v58 = vld [vmem:[#allocation7 + $0x148] sm:$0xff]   ;;  %v3385_v10 = vld [vmem:[#allocation7 + $0x1d8] sm:$0xff]  }
 0x349   :  { %3012 = vmatprep.subr.bf16.mxu0 %v3357_v26  ;;  %2995 = vmatpush3.bf16.msra.mxu1 %v3358_v27  ;;  %v3386_v14 = vld [vmem:[#allocation7 + $0x108] sm:$0xff]   ;;  %v3387_v15 = vld [vmem:[#allocation7 + $0x198] sm:$0xff]   ;;  %v3395_v27 = vld [vmem:[#allocation7 + $0x1c0] sm:$0xff]   ;;  %p3471_p4 = por %p3470_p3, %p3469_p2 }
 0x34a   :  { %v2499_v18 = vmax.f32 %v2496_v11, %v2497_v16  ;;  %v2529_v20 = vmax.f32 %v2526_v17, %v2527_v9  ;;  %3024 = vmatprep.subr.bf16.mxu1 %v3361_v23  ;;  %v3388_v16 = vld [vmem:[#allocation7 + $0x140] sm:$0xff]   ;;  %v3389_v17 = vld [vmem:[#allocation7 + $0x1d0] sm:$0xff]   ;;  %v3393_v25 = vld [vmem:[#allocation7 + $0x188] sm:$0xff]  }
 0x34b   :  { %v3397_v23 = vld [vmem:[#allocation7 + $0x230] sm:$0xff]   ;;  %p3472_p5 = pnand %p3471_p4, %p3465_p1 }
 0x34c   :  { %v2531_v12 = vrot.slane %v2529_v20, 7  ;;  %3013 = vmatpush3.bf16.msra.mxu0 %v3359_v28  ;;  %v3390_v20 = vld [vmem:[#allocation7 + $0x100] sm:$0xff]  }
 0x34d   :  { %3014 = vmatprep.subr.bf16.mxu0 %v3360_v22  ;;  %v3396_v22 = vld [vmem:[#allocation7 + $0x180] sm:$0xff]  }
 0x34e   :  { %v2533_v21 = vsel %vm2455_vm2, %v2499_v18, %v2531_v12  ;;  %v3391_v12 = vld [vmem:[#allocation7 + $0x190] sm:$0xff]  }
 0x34f   :  { %3186 = vmatmul.mubr.msk.bf16.gmra.mxu0 %vm161_vm0, %v3330_v1  ;;  %2534 = vst [vmem:[#allocation12] sm:$0x3] %v2533_v21  ;;  %v3392_v21 = vld [vmem:[#allocation7 + $0x1c8] sm:$0xff]  }
 0x350   :  { %3189 = vmatprep.mubr.msk.bf16.mxu0 %vm3580_vm1, %v3579_v19  ;;  %3015 = vmatpush3.bf16.msra.mxu0 %v3362_v29 }
 0x351   :  { %3016 = vmatprep.subr.bf16.mxu0 %v3364_v30  ;;  %v3398_v30 = vld [vmem:[#allocation7 + $0x228] sm:$0xff]  }
 0x354   :  { %3017 = vmatpush3.bf16.msra.mxu0 %v3366_v31  ;;  %v3399_v31 = vld [vmem:[#allocation7 + $0x220] sm:$0xff]  }
 0x355   :  { %3046 = vmatprep.subr.bf16.mxu0 %v3369_v32  ;;  %v3400_v32 = vld [vmem:[#allocation7 + $0x218] sm:$0xff]  }
 0x357   :  { %3190 = vmatmul.mubr.msk.bf16.gmra.mxu0 %vm161_vm0, %v3331_v24 }
 0x3f7   :  { %v1565_v33 = vpop.f32.mrf.mxu0 }
 0x3f8   :  { %v1603_v39 = vpack.c.bf16 %v1565_v33, %v1565_v33  ;;  %v3401_v33 = vld [vmem:[#allocation7 + $0x210] sm:$0xff]  }
 0x3f9   :  { %v3175_v34 = vpop.f32.mrf.mxu0 }
 0x3fa   :  { %v3402_v34 = vld [vmem:[#allocation7 + $0x208] sm:$0xff]  }
 0x3fb   :  { %v1568_v35 = vpop.f32.mrf.mxu0 }
 0x3fc   :  { %v1604_v37 = vpack.c.bf16 %v1568_v35, %v1568_v35  ;;  %v3403_v35 = vld [vmem:[#allocation7 + $0x200] sm:$0xff]  }
 0x3fd   :  { %v3176_v41 = vpop.f32.mrf.mxu0 }
 0x3fe   :  { %2227 = vmatprep.mubr.bf16.mxu1 %v1604_v37 }
 0x3ff   :  { %v1573_v43 = vpop.f32.mrf.mxu0  ;;  %2228 = vmatmul.mubr.bf16.vlgmr.msra.gmra.mxu1 %v1603_v39 }
 0x400   :  { %3025 = vmatpush3.bf16.msra.mxu1 %v3363_v38  ;;  %v1605_v49 = vpack.c.bf16 %v1573_v43, %v1573_v43 }
 0x401   :  { %v3179_v46 = vpop.f32.mrf.mxu0  ;;  %3026 = vmatprep.subr.bf16.mxu1 %v3365_v42 }
 0x403   :  { %v1576_v40 = vpop.f32.mrf.mxu0 }
 0x404   :  { %v1606_v50 = vpack.c.bf16 %v1576_v40, %v1576_v40  ;;  %3027 = vmatpush3.bf16.msra.mxu1 %v3367_v44 }
 0x405   :  { %3028 = vmatprep.subr.bf16.mxu1 %v3368_v47  ;;  %v3180_v54 = vpop.f32.mrf.mxu0 }
 0x406   :  { %2267 = vmatprep.mubr.bf16.mxu0 %v1606_v50 }
 0x407   :  { %2268 = vmatmul.mubr.bf16.vlgmr.msra.gmra.mxu0 %v1605_v49  ;;  %v3853_v55 = vpop.f32.mrf.mxu0 }
 0x408   :  { %3029 = vmatpush3.bf16.msra.mxu1 %v3370_v36  ;;  %3047 = vmatpush3.bf16.msra.mxu0 %v3371_v51  ;;  %v1607_v26 = vpack.c.bf16 %v3853_v55, %v3853_v55 }
 0x409   :  { %3030 = vmatprep.subr.bf16.mxu1 %v3372_v52  ;;  %3048 = vmatprep.subr.bf16.mxu0 %v3373_v53  ;;  %v3183_v62 = vpop.f32.mrf.mxu0 }
 0x40b   :  { %v1584_v63 = vpop.f32.mrf.mxu0 }
 0x40c   :  { %3031 = vmatpush3.bf16.msra.mxu1 %v3374_v57  ;;  %3049 = vmatpush3.bf16.msra.mxu0 %v3375_v59  ;;  %v1608_v56 = vpack.c.bf16 %v1584_v63, %v1584_v63 }
 0x40d   :  { %3032 = vmatprep.subr.bf16.mxu1 %v3376_v60  ;;  %3050 = vmatprep.subr.bf16.mxu0 %v3377_v61  ;;  %v3184_v5 = vpop.f32.mrf.mxu0 }
 0x40e   :  { %2307 = vmatprep.mubr.bf16.mxu1 %v1608_v56 }
 0x40f   :  { %v1589_v6 = vpop.f32.mrf.mxu0 }
 0x410   :  { %3033 = vmatpush3.bf16.msra.mxu1 %v3378_v0  ;;  %3051 = vmatpush3.bf16.msra.mxu0 %v3379_v2  ;;  %v1609_v29 = vpack.c.bf16 %v1589_v6, %v1589_v6 }
 0x411   :  { %3034 = vmatprep.subr.bf16.mxu1 %v3380_v3  ;;  %3052 = vmatprep.subr.bf16.mxu0 %v3381_v4  ;;  %v3187_v13 = vpop.f32.mrf.mxu0 }
 0x413   :  { %v1592_v11 = vpop.f32.mrf.mxu0 }
 0x414   :  { %3035 = vmatpush3.bf16.msra.mxu1 %v3382_v7  ;;  %3053 = vmatpush3.bf16.msra.mxu0 %v3383_v8  ;;  %v1610_v1 = vpack.c.bf16 %v1592_v11, %v1592_v11 }
 0x415   :  { %3036 = vmatprep.subr.bf16.mxu1 %v3384_v58  ;;  %3054 = vmatprep.subr.bf16.mxu0 %v3385_v10  ;;  %v3188_v9 = vpop.f32.mrf.mxu0 }
 0x416   :  { %2347 = vmatprep.mubr.bf16.mxu0 %v1610_v1 }
 0x417   :  { %v1597_v18 = vpop.f32.mrf.mxu0 }
 0x418   :  { %3037 = vmatpush3.bf16.msra.mxu1 %v3386_v14  ;;  %3055 = vmatpush3.bf16.msra.mxu0 %v3387_v15  ;;  %v1611_v37 = vpack.c.bf16 %v1597_v18, %v1597_v18 }
 0x419   :  { %3038 = vmatprep.subr.bf16.mxu1 %v3388_v16  ;;  %3056 = vmatprep.subr.bf16.mxu0 %v3389_v17  ;;  %v3191_v24 = vpop.f32.mrf.mxu0 }
 0x41b   :  { %v1600_v48 = vpop.f32.mrf.mxu0 }
 0x41c   :  { %3039 = vmatpush3.bf16.msra.mxu1 %v3390_v20  ;;  %3057 = vmatpush3.bf16.msra.mxu0 %v3391_v12 }
 0x41d   :  { %3058 = vmatprep.subr.bf16.mxu0 %v3392_v21  ;;  %3193 = vmatprep.subr.bf16.mxu1 %v3579_v19  ;;  %v3192_v28 = vpop.f32.mrf.mxu0 }
 0x41f   :  { %2308 = vmatmul.mubr.bf16.vlgmr.msra.gmra.mxu1 %v1607_v26 }
 0x420   :  { %3059 = vmatpush3.bf16.msra.mxu0 %v3393_v25  ;;  %3194 = vmatpush3.bf16.msra.mxu1 %v3394_v45 }
 0x421   :  { %3060 = vmatprep.subr.bf16.mxu0 %v3395_v27  ;;  %3195 = vmatprep.subr.bf16.mxu1 %v3579_v19 }
 0x422   :  { %3209 = vmatprep.mubr.msk.bf16.mxu1 %vm3580_vm1, %v3579_v19 }
 0x424   :  { %3061 = vmatpush3.bf16.msra.mxu0 %v3396_v22  ;;  %3196 = vmatpush3.bf16.msra.mxu1 %v3397_v23 }
 0x425   :  { %3197 = vmatprep.subr.bf16.mxu1 %v3579_v19 }
 0x427   :  { %2348 = vmatmul.mubr.bf16.vlgmr.msra.gmra.mxu0 %v1609_v29 }
 0x428   :  { %3198 = vmatpush3.bf16.msra.mxu1 %v3398_v30 }
 0x429   :  { %3199 = vmatprep.subr.bf16.mxu1 %v3579_v19 }
 0x42c   :  { %3200 = vmatpush3.bf16.msra.mxu1 %v3399_v31 }
 0x42d   :  { %3201 = vmatprep.subr.bf16.mxu1 %v3579_v19 }
 0x430   :  { %3202 = vmatpush3.bf16.msra.mxu1 %v3400_v32 }
 0x431   :  { %3203 = vmatprep.subr.bf16.mxu1 %v3579_v19 }
 0x434   :  { %3204 = vmatpush3.bf16.msra.mxu1 %v3401_v33 }
 0x435   :  { %3205 = vmatprep.subr.bf16.mxu1 %v3579_v19 }
 0x438   :  { %3206 = vmatpush3.bf16.msra.mxu1 %v3402_v34 }
 0x439   :  { %3207 = vmatprep.subr.bf16.mxu1 %v3579_v19 }
 0x43c   :  { %3208 = vmatpush3.bf16.msra.mxu1 %v3403_v35 }
 0x43f   :  { %3210 = vmatmul.mubr.bf16.vlgmr.msra.gmra.mxu1 %v1611_v37 }
 0x440   :  { %3475 = shalt.err (!%p3472_p5)
}
 0x441   :  { %2591 = dma.vmem_to_hbm [thread:$0]  %s2589_s1, 32, %s3898_s12, [#allocation13]  }
 0x442   :  { %s3582_s18 = smov [#allocation8]  }
 0x443   :  { %s2555_s19 = sshll.u32 %s3582_s18, 4  ;;  %s2556_s19 = int_to_ptr.vmem [resolvable:$true] %s2555_s19 }
 0x444   :  { %s3484_s20 = scalar_lea.vmem %s2556_s19, 512  ;;  %p3489_p7 = scmp.lt.s32.totalorder %s2556_s19, %s2556_s19 }
 0x445   :  { %p3485_p6 = scmp.ne.s32.totalorder %s2556_s19, %s3484_s20  ;;  %p3490_p8 = scmp.lt.s32.totalorder %s3484_s20, %s3484_s20 }
 0x447   :  { %p3491_p9 = por %p3490_p8, %p3489_p7 }
 0x449   :  { %p3492_p10 = pnand %p3491_p9, %p3485_p6 }
 0x44b   :  { %3495 = shalt.err (!%p3492_p10)
}
 0x44c   :  { %s3583_s21 = smov 128   ;;  %s3584_s22 = smov 8   ;;  %v2742_v55 = vld [vmem:[%s3894_s8] ss:$0 sm:$0xff] }
 0x44d   :  { %2561 = dma.vmem_to_hbm [thread:$0]  %s2556_s19, 512, %s3895_s9, [#allocation4], %s3583_s21, %s3583_s21, %s3584_s22  }
 0x44e   :  { %s3585_s9 = smov [#allocation9]   ;;  %s3586_s24 = smov [#allocation11]  }
 0x44f   :  { %s2568_s2 = sshll.u32 %s3585_s9, 4  ;;  %s2578_s5 = sshll.u32 %s3586_s24, 4  ;;  %s2569_s2 = int_to_ptr.vmem [resolvable:$true] %s2568_s2  ;;  %s2579_s5 = int_to_ptr.vmem [resolvable:$true] %s2578_s5 }
 0x450   :  { %s3504_s8 = scalar_lea.vmem %s2569_s2, 128  ;;  %p3509_p12 = scmp.lt.s32.totalorder %s2569_s2, %s2569_s2 }
 0x451   :  { %p3505_p11 = scmp.ne.s32.totalorder %s2569_s2, %s3504_s8  ;;  %p3510_p13 = scmp.lt.s32.totalorder %s3504_s8, %s3504_s8 }
 0x453   :  { %p3511_p0 = por %p3510_p13, %p3509_p12 }
 0x455   :  { %p3512_p1 = pnand %p3511_p0, %p3505_p11 }
 0x4bf   :  { %v2996_v19 = vpop.f32.mrf.mxu1 }
 0x4c1   :  { %v2997_v38 = vpop.f32.mrf.mxu1 }
 0x4c2   :  { %v2998_v54 = vadd.f32 %v2997_v38, %v2996_v19 }
 0x4c3   :  { %v2999_v39 = vpop.f32.mrf.mxu1 }
 0x4c4   :  { %v2230_v59 = vadd.f32 %v2998_v54, %v2742_v55 }
 0x4c5   :  { %v3000_v41 = vpop.f32.mrf.mxu1 }
 0x4c7   :  { %v3018_v42 = vpop.f32.mrf.mxu0 }
 0x4c9   :  { %v3019_v43 = vpop.f32.mrf.mxu0 }
 0x4ca   :  { %v3020_v57 = vadd.f32 %v3019_v43, %v3018_v42 }
 0x4cb   :  { %v3021_v44 = vpop.f32.mrf.mxu0 }
 0x4cc   :  { %v2270_v61 = vadd.f32 %v3020_v57, %v2230_v59 }
 0x4cd   :  { %v3022_v46 = vpop.f32.mrf.mxu0 }
 0x4df   :  { %v3040_v47 = vpop.f32.mrf.mxu1 }
 0x4e1   :  { %v3041_v49 = vpop.f32.mrf.mxu1 }
 0x4e2   :  { %v3042_v60 = vadd.f32 %v3041_v49, %v3040_v47 }
 0x4e3   :  { %v3043_v40 = vpop.f32.mrf.mxu1 }
 0x4e4   :  { %v2310_v63 = vadd.f32 %v3042_v60, %v2270_v61 }
 0x4e5   :  { %v3044_v50 = vpop.f32.mrf.mxu1 }
 0x4e7   :  { %v3062_v36 = vpop.f32.mrf.mxu0 }
 0x4e9   :  { %v3063_v51 = vpop.f32.mrf.mxu0 }
 0x4ea   :  { %v3064_v62 = vadd.f32 %v3063_v51, %v3062_v36 }
 0x4eb   :  { %v3065_v52 = vpop.f32.mrf.mxu0 }
 0x4ec   :  { %v2350_v0 = vadd.f32 %v3064_v62, %v2310_v63 }
 0x4ed   :  { %v3066_v53 = vpop.f32.mrf.mxu0 }
 0x4ff   :  { %v2389_v2 = vpop.f32.mrf.mxu1 }
 0x500   :  { %v2390_v56 = vadd.f32 %v2389_v2, %v2350_v0 }
 0x501   :  { %v3211_v3 = vpop.f32.mrf.mxu1 }
 0x502   :  { %v2395_v4 = vmax.f32 %v2390_v56, 0.0 }
 0x503   :  { %v2392_v5 = vpop.f32.mrf.mxu1 }
 0x504   :  { %v2536_v6 = vrot.slane %v2395_v4, 1  ;;  %2396 = vst [vmem:[#allocation9] sm:$0xff] %v2395_v4 }
 0x505   :  { %v3212_v7 = vpop.f32.mrf.mxu1 }
 0x506   :  { %3515 = shalt.err (!%p3512_p1)
}
 0x507   :  { %2571 = dma.vmem_to_hbm [thread:$0]  %s2569_s2, 128, %s3896_s10, [#allocation10]  }
 0x508   :  { %s3524_s26 = scalar_lea.vmem %s2579_s5, 128  ;;  %p3529_p3 = scmp.lt.s32.totalorder %s2579_s5, %s2579_s5 }
 0x509   :  { %p3525_p2 = scmp.ne.s32.totalorder %s2579_s5, %s3524_s26  ;;  %p3530_p4 = scmp.lt.s32.totalorder %s3524_s26, %s3524_s26 }
 0x50b   :  { %p3531_p5 = por %p3530_p4, %p3529_p3 }
 0x50d   :  { %p3532_p6 = pnand %p3531_p5, %p3525_p2 }
 0x50f   :  { %3535 = shalt.err (!%p3532_p6)
}
 0x510   :  { %2581 = dma.vmem_to_hbm [thread:$0]  %s2579_s5, 128, %s3897_s11, [#allocation10]   ;;  %v2538_v8 = vmax.f32 %v2395_v4, %v2536_v6  ;;  %v2539_v58 = vrot.slane %v2395_v4, 2  ;;  %v2542_v13 = vrot.slane %v2395_v4, 3 }
 0x511   :  { %s3587_s7 = smov [#allocation14]  }
 0x512   :  { %v2541_v10 = vmax.f32 %v2538_v8, %v2539_v58  ;;  %s2598_s29 = sshll.u32 %s3587_s7, 4  ;;  %s2599_s29 = int_to_ptr.vmem [resolvable:$true] %s2598_s29 }
 0x513   :  { %s3544_s10 = scalar_lea.vmem %s2599_s29, 32  ;;  %p3549_p8 = scmp.lt.s32.totalorder %s2599_s29, %s2599_s29 }
 0x514   :  { %v2544_v11 = vmax.f32 %v2541_v10, %v2542_v13  ;;  %p3545_p7 = scmp.ne.s32.totalorder %s2599_s29, %s3544_s10  ;;  %p3550_p9 = scmp.lt.s32.totalorder %s3544_s10, %s3544_s10 }
 0x516   :  { %v2546_v14 = vrot.slane %v2544_v11, 3  ;;  %p3551_p10 = por %p3550_p9, %p3549_p8 }
 0x518   :  { %v2548_v15 = vsel %vm2455_vm2, %v2544_v11, %v2546_v14  ;;  %p3552_p11 = pnand %p3551_p10, %p3545_p7 }
 0x519   :  { %2549 = vst [vmem:[#allocation14] sm:$0x3] %v2548_v15 }
 0x51a   :  { %3555 = shalt.err (!%p3552_p11)
}
 0x51b   :  { %2601 = dma.vmem_to_hbm [thread:$0]  %s2599_s29, 32, %s3899_s13, [#allocation13]  }
 0x51c   :  { %3568 = dma.done.wait [#allocation4], 512  }
 0x51d   :  { %3569 = vsyncadd [#allocation4], 4294966784 }
 0x51e   :  { %3570 = dma.done.wait [#allocation10], 256  }
 0x51f   :  { %3571 = vsyncadd [#allocation10], 4294967040 }
 0x520   :  { %3572 = dma.done.wait [#allocation13], 64  }
 0x521   :  { %3573 = vsyncadd [#allocation13], 4294967232 }
 0x522   :  { %2617 = vsyncpa [#allocation3], 1 }
 0x523   :  { %2618 = vsyncpa [#allocation6], 1 }
 0x524   :  { %2619 = vsyncpa [#allocation4], 1 }
 0x525   :  { %2620 = vsyncpa [#allocation10], 1 }
 0x526   :  { %2621 = vsyncpa [#allocation13], 1 }

</bundles_post_ra>
